<compile_context>
chip_gen: v6e
topology: v6e:2x2x1
jax: 0.10.0
libtpu: 0.0.40
codegen_flags: <defaults>
</compile_context>

<pallas_src>
import jax
import jax.numpy as jnp
from jax.experimental import pallas as pl
from jax.experimental.pallas import tpu as pltpu


def _round_down(x, m):
    return (x // m) * m


def _round_up(x, m):
    return (x + m - 1) // m * m


def _vmem_budgets():
    """Generation-aware (tile-sizing budget, mosaic vmem limit) in bytes."""
    try:
        cap = int(pltpu.get_tpu_info().vmem_capacity_bytes)
    except Exception:  # conservative (v7x-sized) fallback
        cap = 64 * 1024 * 1024
    vmem_limit = min(cap * 3 // 4, 96 * 1024 * 1024)   # ~48 MiB on v7x, 96 MiB on v5e/v6e
    budget = min(cap * 3 // 8, 48 * 1024 * 1024)       # ~24 MiB on v7x, 48 MiB on v5e/v6e
    return budget, vmem_limit


# ---------------------------------------------------------------------------
# Fast path: whole problem resident in VMEM, single fused kernel.
# ---------------------------------------------------------------------------
def _fused_kernel(z_ref, w1_ref, b1_ref, w2t_ref, out_ref):
    # z_ref: (M, N, D);  w1_ref: (D, H);  b1_ref: (1, H);  w2t_ref: (1, H)
    M, N, _ = z_ref.shape
    w1 = w1_ref[...]
    b1 = b1_ref[...]
    w2t = w2t_ref[...]
    inv_n = 1.0 / float(N)

    # Per-metapath attention logit: mean_n( tanh(z W1 + b1) ) . W2
    logits = []
    for m in range(M):  # M is tiny; static unroll
        zm = z_ref[m].astype(jnp.float32)                                   # (N, D)
        h = jnp.tanh(jnp.dot(zm, w1, preferred_element_type=jnp.float32) + b1)
        s = jnp.sum(h, axis=0, keepdims=True) * inv_n                       # (1, H)
        logits.append(jnp.sum(s * w2t, axis=1, keepdims=True))              # (1, 1)

    # Numerically stable softmax over the (static, tiny) metapath axis.
    mx = logits[0]
    for m in range(1, M):
        mx = jnp.maximum(mx, logits[m])
    exps = [jnp.exp(l - mx) for l in logits]
    denom = exps[0]
    for m in range(1, M):
        denom = denom + exps[m]
    inv_denom = 1.0 / denom

    acc = (exps[0] * inv_denom) * z_ref[0].astype(jnp.float32)              # (N, D)
    for m in range(1, M):
        acc = acc + (exps[m] * inv_denom) * z_ref[m].astype(jnp.float32)
    out_ref[...] = acc.astype(out_ref.dtype)


# ---------------------------------------------------------------------------
# Pass 1: hsum[m, :] = sum_n tanh(z[m, n, :] @ W1 + b1)   (resident accumulator)
# ---------------------------------------------------------------------------
def _hidden_sum_kernel(z_ref, w1_ref, b1_ref, hsum_ref):
    # z_ref: (M, T, D_eff) tile;  w1_ref: (D_eff, H_eff);  b1_ref: (1, H_eff)
    # hsum_ref: (M, H_eff) accumulator block (one per "parallel" slice; leading
    #           grid-axis dim is squeezed out by the BlockSpec).
    @pl.when(pl.program_id(1) == 0)
    def _():
        hsum_ref[...] = jnp.zeros_like(hsum_ref)

    M, T, D_eff = z_ref.shape
    # Free sublane merge (T % 8 == 0) -> one big MXU matmul instead of M small ones.
    z2 = z_ref[...].reshape(M * T, D_eff).astype(jnp.float32)
    h = jnp.tanh(
        jnp.dot(z2, w1_ref[...], preferred_element_type=jnp.float32) + b1_ref[...]
    )                                                                        # (M*T, H_eff)
    parts = [jnp.sum(h[m * T:(m + 1) * T], axis=0, keepdims=True) for m in range(M)]
    hsum_ref[...] += jnp.concatenate(parts, axis=0)                          # (M, H_eff)


# ---------------------------------------------------------------------------
# Pass 2: out[:] = sum_m beta[m] * z[m, :]   (lane-dense flat view, streaming)
# ---------------------------------------------------------------------------
def _weighted_sum_kernel(beta_ref, z_ref, out_ref):
    # beta_ref: (M,) float32 scalars in SMEM;  z_ref: (M, TILE_F);  out_ref: (1, TILE_F)
    M = z_ref.shape[0]
    acc = beta_ref[0] * z_ref[0:1, :].astype(jnp.float32)
    for m in range(1, M):  # unrolled; single (1, TILE_F) accumulator stays live
        acc = acc + beta_ref[m] * z_ref[m:m + 1, :].astype(jnp.float32)
    out_ref[...] = acc.astype(out_ref.dtype)


# ---------------------------------------------------------------------------
# Wrapper
# ---------------------------------------------------------------------------
def semantic_attention(z_stack, w1, b1, w2, *, max_tile_rows=None, max_tile_lanes=None):
    """HAN SemanticAttention forward.

    z_stack: (M, N, D) stacked per-metapath node embeddings (kept in its own dtype).
    w1: (D, H), b1: (1, H) or (H,), w2: (H, 1) or (H,).
    Returns (N, D) in z_stack.dtype.  max_tile_rows / max_tile_lanes may only
    LOWER the auto-sized tiles (useful for tests); they never raise them.
    """
    M, N, D = z_stack.shape
    H = w1.shape[1]
    esz = jnp.dtype(z_stack.dtype).itemsize

    w1 = w1.astype(jnp.float32)
    b1 = b1.astype(jnp.float32).reshape(1, H)
    w2 = w2.astype(jnp.float32).reshape(H, 1)

    budget, vmem_limit = _vmem_budgets()

    # Padded (layout) sizes used for VMEM accounting: lanes round to 128, sublanes to 8.
    d_lp = _round_up(D, 128)
    h_lp = _round_up(H, 128)

    # ---------------- small-problem fast path: single fused kernel ----------------
    n_p8 = _round_up(N, 8)
    fused_bytes = (M * n_p8 * d_lp * esz            # z resident
                   + n_p8 * d_lp * esz              # output
                   + 2 * M * n_p8 * h_lp * 4        # hidden + tanh temporaries (f32)
                   + (D * h_lp + 2 * h_lp) * 4)     # weights
    if fused_bytes <= min(8 * 1024 * 1024, budget // 2):
        return pl.pallas_call(
            _fused_kernel,
            out_shape=jax.ShapeDtypeStruct((N, D), z_stack.dtype),
            compiler_params=pltpu.CompilerParams(vmem_limit_bytes=vmem_limit),
        )(z_stack, w1, b1, w2.reshape(1, H))

    # ---------------- pass 1: per-metapath hidden sums over all nodes ----------------
    # Lane folding: pack G = 128 // D consecutive nodes into the 128-lane axis with a
    # block-diagonal W1 (only when the reshape of the full Z is free, i.e. N % G == 0).
    if D < 128 and 128 % D == 0 and N % (128 // D) == 0:
        G = 128 // D
    else:
        G = 1
    D_eff, H_eff, N_eff = G * D, G * H, N // G
    if G > 1:
        z_eff = z_stack.reshape(M, N_eff, D_eff)                    # free contiguous reshape
        w1_eff = jnp.kron(jnp.eye(G, dtype=jnp.float32), w1)        # block-diag (D_eff, H_eff)
        b1_eff = jnp.tile(b1, (1, G))                               # (1, H_eff)
    else:
        z_eff, w1_eff, b1_eff = z_stack, w1, b1
    de_lp = _round_up(D_eff, 128)
    he_lp = _round_up(H_eff, 128)

    # Largest row tile that fits the per-generation VMEM budget (caller may only lower it).
    per_row = (2 * M * de_lp * esz        # double-buffered z tile
               + M * de_lp * 4            # in-kernel f32 promotion
               + 2 * M * he_lp * 4)       # hidden + tanh temporaries (f32)
    fixed = 4 * he_lp * (_round_up(D_eff, 8) + 8 * M + 32)          # weights + accumulators
    t_cap = max(8, _round_down(max(budget - fixed, 8 * per_row) // per_row, 8))
    if max_tile_rows is not None:
        t_cap = min(t_cap, max(8, _round_down(int(max_tile_rows), 8)))

    n_par = 2 if N_eff >= 16 else 1       # split the reduction across v7x's two TensorCores
    tiles_per_par = pl.cdiv(N_eff, n_par * t_cap)
    T = _round_down(N_eff // (n_par * tiles_per_par), 8)
    if T < 8:
        tiles_per_par = 0                 # tiny N: everything goes through the JAX tail

    covered_rows = n_par * tiles_per_par * T
    covered_nodes = covered_rows * G

    if tiles_per_par > 0:
        partials = pl.pallas_call(
            _hidden_sum_kernel,
            out_shape=jax.ShapeDtypeStruct((n_par, M, H_eff), jnp.float32),
            grid_spec=pltpu.PrefetchScalarGridSpec(
                num_scalar_prefetch=0,
                grid=(n_par, tiles_per_par),
                in_specs=[
                    pl.BlockSpec((M, T, D_eff),
                                 lambda c, i: (0, c * tiles_per_par + i, 0)),
                    pl.BlockSpec((D_eff, H_eff), lambda c, i: (0, 0)),
                    pl.BlockSpec((1, H_eff), lambda c, i: (0, 0)),
                ],
                # Leading (per-core) dim squeezed out of the kernel ref.
                out_specs=pl.BlockSpec((None, M, H_eff), lambda c, i: (c, 0, 0)),
            ),
            compiler_params=pltpu.CompilerParams(
                dimension_semantics=("parallel", "arbitrary"),
                vmem_limit_bytes=vmem_limit,
            ),
        )(z_eff, w1_eff, b1_eff)
        hsum_eff = jnp.sum(partials, axis=0)                         # (M, H_eff)
        hsum = hsum_eff.reshape(M, G, H).sum(axis=1) if G > 1 else hsum_eff
    else:
        hsum = jnp.zeros((M, H), jnp.float32)

    # Row tail (< one tile per core slice) that the exact-tile grid did not cover:
    # plain JAX, no pad copy and no per-tile masks in the kernel.
    if covered_nodes < N:
        z_tail = z_stack[:, covered_nodes:, :].astype(jnp.float32)   # (M, nt, D)
        h_tail = jnp.tanh(jnp.einsum("mnd,dh->mnh", z_tail, w1) + b1)
        hsum = hsum + jnp.sum(h_tail, axis=1)

    # Tiny (M,) math between passes: W2 hoisted after the node mean (linear), softmax.
    logits = jnp.dot(hsum / jnp.float32(N), w2)[:, 0]                # (M,)
    beta = jax.nn.softmax(logits, axis=0).astype(jnp.float32)

    # ---------------- pass 2: out = sum_m beta[m] * z[m]  (lane-dense flat view) ---------
    F = N * D
    z_flat = z_stack.reshape(M, F)                                   # free contiguous reshape
    per_col = 2 * 8 * esz + 2 * 8 * esz + 3 * 8 * 4                  # dbl-buf z + dbl-buf out + f32 temps
    f_cap = max(128, _round_down(budget // per_col, 128))
    if max_tile_lanes is not None:
        f_cap = min(f_cap, max(128, _round_down(int(max_tile_lanes), 128)))
    if F <= f_cap:
        tile_f, n_tiles2 = F, 1                                      # single full block
    else:
        tile_f = f_cap
        n_tiles2 = pl.cdiv(F, tile_f)                                # edge block clipped on writeback

    out_flat = pl.pallas_call(
        _weighted_sum_kernel,
        out_shape=jax.ShapeDtypeStruct((1, F), z_stack.dtype),
        grid_spec=pltpu.PrefetchScalarGridSpec(
            num_scalar_prefetch=0,
            grid=(n_tiles2,),
            in_specs=[
                pl.BlockSpec(memory_space=pltpu.MemorySpace.SMEM),   # beta (M,) scalars
                pl.BlockSpec((M, tile_f), lambda i: (0, i)),
            ],
            out_specs=pl.BlockSpec((1, tile_f), lambda i: (0, i)),
        ),
        compiler_params=pltpu.CompilerParams(
            dimension_semantics=("parallel",),                       # megacore-shardable stream
            vmem_limit_bytes=vmem_limit,
        ),
    )(beta, z_flat)
    return out_flat.reshape(N, D)


def semantic_attention_ref(z_stack, w1, b1, w2):
    """Pure-JAX reference mirroring the PyTorch module."""
    z32 = z_stack.astype(jnp.float32)
    w1 = w1.astype(jnp.float32)
    b1 = b1.astype(jnp.float32).reshape(1, -1)
    w2 = w2.astype(jnp.float32).reshape(-1, 1)
    h = jnp.tanh(jnp.einsum("mnd,dh->mnh", z32, w1) + b1)            # (M, N, H)
    s = jnp.einsum("mnh,ho->mno", h, w2)[..., 0]                     # (M, N)
    beta = jax.nn.softmax(s.mean(axis=1), axis=0)                    # (M,)
    return jnp.einsum("m,mnd->nd", beta, z32).astype(z_stack.dtype)  # (N, D)


if __name__ == "__main__":
    key = jax.random.PRNGKey(0)

    def make_case(k, M, N, D, H):
        kz, kw1, kb1, kw2 = jax.random.split(k, 4)
        z = jax.random.normal(kz, (M, N, D), jnp.float32)
        w1 = jax.random.normal(kw1, (D, H), jnp.float32) * 0.1
        b1 = jax.random.normal(kb1, (1, H), jnp.float32) * 0.1
        w2 = jax.random.normal(kw2, (H, 1), jnp.float32) * 0.1
        return z, w1, b1, w2

    fn = jax.jit(semantic_attention, static_argnames=("max_tile_rows", "max_tile_lanes"))

    # Case 1: small HAN-sized toy -> fused single-kernel fast path.
    z, w1, b1, w2 = make_case(jax.random.fold_in(key, 1), 3, 200, 32, 32)
    out = jax.block_until_ready(fn(z, w1, b1, w2))
    ref = semantic_attention_ref(z, w1, b1, w2)
    assert out.shape == (200, 32)
    assert jnp.allclose(out, ref, atol=1e-3, rtol=1e-3), "case 1 mismatch"

    # Case 2: tiled path with lane folding (G=2), the 2-way "parallel" split of the
    # pass-1 reduction, a JAX-handled row tail, and a partial edge tile in the
    # lane-dense pass 2.  Tile caps only LOWER the auto-sized tiles so the
    # multi-tile machinery is exercised at modest N.
    z, w1, b1, w2 = make_case(jax.random.fold_in(key, 2), 4, 4100, 64, 128)
    out = jax.block_until_ready(fn(z, w1, b1, w2, max_tile_rows=256, max_tile_lanes=65536))
    ref = semantic_attention_ref(z, w1, b1, w2)
    assert out.shape == (4100, 64)
    assert jnp.allclose(out, ref, atol=1e-3, rtol=1e-3), "case 2 mismatch"

    # Case 3: D that does not divide 128 -> unfolded pass-1 fallback (auto-sized tiles).
    z, w1, b1, w2 = make_case(jax.random.fold_in(key, 3), 2, 20000, 48, 64)
    out = jax.block_until_ready(fn(z, w1, b1, w2))
    ref = semantic_attention_ref(z, w1, b1, w2)
    assert out.shape == (20000, 48)
    assert jnp.allclose(out, ref, atol=1e-3, rtol=1e-3), "case 3 mismatch"

    print("KERNEL_OK")
</pallas_src>

<mosaic_0001>
module attributes {stable_mosaic.version = 11 : i64} {
  func.func @_fused_kernel(%arg0: memref<3x200x32xf32, #tpu.memory_space<vmem>>, %arg1: memref<32x32xf32, #tpu.memory_space<vmem>>, %arg2: memref<1x32xf32, #tpu.memory_space<vmem>>, %arg3: memref<1x32xf32, #tpu.memory_space<vmem>>, %arg4: memref<200x32xf32, #tpu.memory_space<vmem>>) attributes {dimension_semantics = [], scalar_prefetch = 0 : i64, scratch_operands = 0 : i64, tpu.core_type = #tpu.core_type<tc>} {
    %c0 = arith.constant 0 : index
    %c0_0 = arith.constant 0 : index
    %0 = vector.load %arg1[%c0, %c0_0] : memref<32x32xf32, #tpu.memory_space<vmem>>, vector<32x32xf32>
    %c0_1 = arith.constant 0 : index
    %c0_2 = arith.constant 0 : index
    %1 = vector.load %arg2[%c0_1, %c0_2] : memref<1x32xf32, #tpu.memory_space<vmem>>, vector<1x32xf32>
    %c0_3 = arith.constant 0 : index
    %c0_4 = arith.constant 0 : index
    %2 = vector.load %arg3[%c0_3, %c0_4] : memref<1x32xf32, #tpu.memory_space<vmem>>, vector<1x32xf32>
    %c0_5 = arith.constant 0 : index
    %c0_6 = arith.constant 0 : index
    %c0_7 = arith.constant 0 : index
    %3 = vector.load %arg0[%c0_5, %c0_6, %c0_7] : memref<3x200x32xf32, #tpu.memory_space<vmem>>, vector<1x200x32xf32>
    %4 = vector.shape_cast %3 : vector<1x200x32xf32> to vector<200x32xf32>
    %cst = arith.constant dense<0.000000e+00> : vector<200x32xf32>
    %5 = tpu.matmul %4, %0, %cst {dimension_numbers = #tpu.dot_dimension_numbers<[1], [0], [0], [1], [0, 0, 1, 1], [], []>} : vector<200x32xf32>, vector<32x32xf32>, vector<200x32xf32> -> vector<200x32xf32>
    %6 = vector.broadcast %1 : vector<1x32xf32> to vector<200x32xf32>
    %7 = arith.addf %5, %6 : vector<200x32xf32>
    %8 = math.tanh %7 : vector<200x32xf32>
    %cst_8 = arith.constant dense<0.000000e+00> : vector<32xf32>
    %9 = vector.multi_reduction <add>, %8, %cst_8 [0] : vector<200x32xf32> to vector<32xf32>
    %10 = vector.shape_cast %9 : vector<32xf32> to vector<1x32xf32>
    %cst_9 = arith.constant 5.000000e-03 : f32
    %11 = vector.broadcast %cst_9 : f32 to vector<1x32xf32>
    %12 = arith.mulf %10, %11 : vector<1x32xf32>
    %13 = arith.mulf %12, %2 : vector<1x32xf32>
    %cst_10 = arith.constant dense<0.000000e+00> : vector<1xf32>
    %14 = vector.multi_reduction <add>, %13, %cst_10 [1] : vector<1x32xf32> to vector<1xf32>
    %15 = vector.shape_cast %14 : vector<1xf32> to vector<1x1xf32>
    %c1 = arith.constant 1 : index
    %c0_11 = arith.constant 0 : index
    %c0_12 = arith.constant 0 : index
    %16 = vector.load %arg0[%c1, %c0_11, %c0_12] : memref<3x200x32xf32, #tpu.memory_space<vmem>>, vector<1x200x32xf32>
    %17 = vector.shape_cast %16 : vector<1x200x32xf32> to vector<200x32xf32>
    %cst_13 = arith.constant dense<0.000000e+00> : vector<200x32xf32>
    %18 = tpu.matmul %17, %0, %cst_13 {dimension_numbers = #tpu.dot_dimension_numbers<[1], [0], [0], [1], [0, 0, 1, 1], [], []>} : vector<200x32xf32>, vector<32x32xf32>, vector<200x32xf32> -> vector<200x32xf32>
    %19 = vector.broadcast %1 : vector<1x32xf32> to vector<200x32xf32>
    %20 = arith.addf %18, %19 : vector<200x32xf32>
    %21 = math.tanh %20 : vector<200x32xf32>
    %cst_14 = arith.constant dense<0.000000e+00> : vector<32xf32>
    %22 = vector.multi_reduction <add>, %21, %cst_14 [0] : vector<200x32xf32> to vector<32xf32>
    %23 = vector.shape_cast %22 : vector<32xf32> to vector<1x32xf32>
    %cst_15 = arith.constant 5.000000e-03 : f32
    %24 = vector.broadcast %cst_15 : f32 to vector<1x32xf32>
    %25 = arith.mulf %23, %24 : vector<1x32xf32>
    %26 = arith.mulf %25, %2 : vector<1x32xf32>
    %cst_16 = arith.constant dense<0.000000e+00> : vector<1xf32>
    %27 = vector.multi_reduction <add>, %26, %cst_16 [1] : vector<1x32xf32> to vector<1xf32>
    %28 = vector.shape_cast %27 : vector<1xf32> to vector<1x1xf32>
    %c2 = arith.constant 2 : index
    %c0_17 = arith.constant 0 : index
    %c0_18 = arith.constant 0 : index
    %29 = vector.load %arg0[%c2, %c0_17, %c0_18] : memref<3x200x32xf32, #tpu.memory_space<vmem>>, vector<1x200x32xf32>
    %30 = vector.shape_cast %29 : vector<1x200x32xf32> to vector<200x32xf32>
    %cst_19 = arith.constant dense<0.000000e+00> : vector<200x32xf32>
    %31 = tpu.matmul %30, %0, %cst_19 {dimension_numbers = #tpu.dot_dimension_numbers<[1], [0], [0], [1], [0, 0, 1, 1], [], []>} : vector<200x32xf32>, vector<32x32xf32>, vector<200x32xf32> -> vector<200x32xf32>
    %32 = vector.broadcast %1 : vector<1x32xf32> to vector<200x32xf32>
    %33 = arith.addf %31, %32 : vector<200x32xf32>
    %34 = math.tanh %33 : vector<200x32xf32>
    %cst_20 = arith.constant dense<0.000000e+00> : vector<32xf32>
    %35 = vector.multi_reduction <add>, %34, %cst_20 [0] : vector<200x32xf32> to vector<32xf32>
    %36 = vector.shape_cast %35 : vector<32xf32> to vector<1x32xf32>
    %cst_21 = arith.constant 5.000000e-03 : f32
    %37 = vector.broadcast %cst_21 : f32 to vector<1x32xf32>
    %38 = arith.mulf %36, %37 : vector<1x32xf32>
    %39 = arith.mulf %38, %2 : vector<1x32xf32>
    %cst_22 = arith.constant dense<0.000000e+00> : vector<1xf32>
    %40 = vector.multi_reduction <add>, %39, %cst_22 [1] : vector<1x32xf32> to vector<1xf32>
    %41 = vector.shape_cast %40 : vector<1xf32> to vector<1x1xf32>
    %42 = arith.maximumf %15, %28 : vector<1x1xf32>
    %43 = arith.maximumf %42, %41 : vector<1x1xf32>
    %44 = arith.subf %15, %43 : vector<1x1xf32>
    %45 = math.exp %44 : vector<1x1xf32>
    %46 = arith.subf %28, %43 : vector<1x1xf32>
    %47 = math.exp %46 : vector<1x1xf32>
    %48 = arith.subf %41, %43 : vector<1x1xf32>
    %49 = math.exp %48 : vector<1x1xf32>
    %50 = arith.addf %45, %47 : vector<1x1xf32>
    %51 = arith.addf %50, %49 : vector<1x1xf32>
    %cst_23 = arith.constant 1.000000e+00 : f32
    %52 = vector.broadcast %cst_23 : f32 to vector<1x1xf32>
    %53 = arith.divf %52, %51 : vector<1x1xf32>
    %54 = arith.mulf %45, %53 : vector<1x1xf32>
    %c0_24 = arith.constant 0 : index
    %c0_25 = arith.constant 0 : index
    %c0_26 = arith.constant 0 : index
    %55 = vector.load %arg0[%c0_24, %c0_25, %c0_26] : memref<3x200x32xf32, #tpu.memory_space<vmem>>, vector<1x200x32xf32>
    %56 = vector.shape_cast %55 : vector<1x200x32xf32> to vector<200x32xf32>
    %57 = vector.broadcast %54 : vector<1x1xf32> to vector<200x32xf32>
    %58 = arith.mulf %57, %56 : vector<200x32xf32>
    %59 = arith.mulf %47, %53 : vector<1x1xf32>
    %c1_27 = arith.constant 1 : index
    %c0_28 = arith.constant 0 : index
    %c0_29 = arith.constant 0 : index
    %60 = vector.load %arg0[%c1_27, %c0_28, %c0_29] : memref<3x200x32xf32, #tpu.memory_space<vmem>>, vector<1x200x32xf32>
    %61 = vector.shape_cast %60 : vector<1x200x32xf32> to vector<200x32xf32>
    %62 = vector.broadcast %59 : vector<1x1xf32> to vector<200x32xf32>
    %63 = arith.mulf %62, %61 : vector<200x32xf32>
    %64 = arith.addf %58, %63 : vector<200x32xf32>
    %65 = arith.mulf %49, %53 : vector<1x1xf32>
    %c2_30 = arith.constant 2 : index
    %c0_31 = arith.constant 0 : index
    %c0_32 = arith.constant 0 : index
    %66 = vector.load %arg0[%c2_30, %c0_31, %c0_32] : memref<3x200x32xf32, #tpu.memory_space<vmem>>, vector<1x200x32xf32>
    %67 = vector.shape_cast %66 : vector<1x200x32xf32> to vector<200x32xf32>
    %68 = vector.broadcast %65 : vector<1x1xf32> to vector<200x32xf32>
    %69 = arith.mulf %68, %67 : vector<200x32xf32>
    %70 = arith.addf %64, %69 : vector<200x32xf32>
    %c0_33 = arith.constant 0 : index
    %c0_34 = arith.constant 0 : index
    %71 = vector.load %arg4[%c0_33, %c0_34] : memref<200x32xf32, #tpu.memory_space<vmem>>, vector<200x32xf32>
    tpu.vector_store %arg4[%c0_33, %c0_34], %70 {strides = array<i32>} : memref<200x32xf32, #tpu.memory_space<vmem>>, vector<200x32xf32>,
    return
  }
}

</mosaic_0001>

<bundles_post_ra>
// kernel: semantic_attention.1
= control target key start
LH: loop header
LB: loop body
LE: loop exit
PB: predicated region body
PF: predicated region fallthrough
CT: control target
= control target key end

     0   :  { %v2047_v0 = vmov 0.0   ;;  %vm54_vm0 = vcmask 261120   ;;  %vm2048_vm1 = vmmov 0   ;;  %vm402_vm2 = vcmask 253952   ;;  %s3379_s1 = inlined_call_operand.vmem [shape: f32[32,32], index: 1, kind: input, shape index: {}]   ;;  %s3380_s0 = inlined_call_operand.vmem [shape: f32[3,200,32], index: 0, kind: input, shape index: {}]   ;;  %s3381_s2 = inlined_call_operand.vmem [shape: f32[1,32], index: 2, kind: input, shape index: {}]   ;;  %s3382_s3 = inlined_call_operand.vmem [shape: f32[1,32], index: 3, kind: input, shape index: {}]   ;;  %s3383_s4 = inlined_call_operand.vmem [shape: f32[200,32], index: 4, kind: output, shape index: {}]  }
   0x1   :  { %1555 = vmatprep.subr.mxu0 %v2047_v0  ;;  %1804 = vmatprep.subr.mxu1 %v2047_v0  ;;  %v20_v1 = vld [vmem:[%s3379_s1 + $0x18] sm:$0xff]  ;;  %v19_v2 = vld [vmem:[%s3379_s1 + $0x10] sm:$0xff]  ;;  %v18_v3 = vld [vmem:[%s3379_s1 + $0x8] sm:$0xff] }
   0x2   :  { %1556 = vmatpush3.msra.mxu0 %v20_v1  ;;  %1808 = vmatpush3.msra.mxu1 %v20_v1  ;;  %v17_v4 = vld [vmem:[%s3379_s1] sm:$0xff]  ;;  %v36_v6 = vld [vmem:[%s3380_s0 + $0x68] sm:$0xff]  ;;  %v37_v8 = vld [vmem:[%s3380_s0 + $0x70] sm:$0xff] }
   0x3   :  { %1557 = vmatprep.subr.mxu0 %v2047_v0  ;;  %1805 = vmatprep.subr.mxu1 %v2047_v0  ;;  %v23_v5 = vld [vmem:[%s3380_s0] sm:$0xff]  ;;  %v24_v7 = vld [vmem:[%s3380_s0 + $0x8] sm:$0xff]  ;;  %v25_v9 = vld [vmem:[%s3380_s0 + $0x10] sm:$0xff] }
   0x4   :  { %1558 = vmatpush3.msra.mxu0 %v19_v2  ;;  %1809 = vmatpush3.msra.mxu1 %v19_v2  ;;  %v38_v10 = vld [vmem:[%s3380_s0 + $0x78] sm:$0xff]  ;;  %v39_v12 = vld [vmem:[%s3380_s0 + $0x80] sm:$0xff]  ;;  %v40_v14 = vld [vmem:[%s3380_s0 + $0x88] sm:$0xff] }
   0x5   :  { %1559 = vmatprep.subr.mxu0 %v2047_v0  ;;  %1806 = vmatprep.subr.mxu1 %v2047_v0  ;;  %v26_v11 = vld [vmem:[%s3380_s0 + $0x18] sm:$0xff]  ;;  %v27_v13 = vld [vmem:[%s3380_s0 + $0x20] sm:$0xff]  ;;  %v28_v15 = vld [vmem:[%s3380_s0 + $0x28] sm:$0xff] }
   0x6   :  { %1560 = vmatpush3.msra.mxu0 %v18_v3  ;;  %1810 = vmatpush3.msra.mxu1 %v18_v3  ;;  %v41_v16 = vld [vmem:[%s3380_s0 + $0x90] sm:$0xff]  ;;  %v42_v18 = vld [vmem:[%s3380_s0 + $0x98] sm:$0xff]  ;;  %v43_v20 = vld [vmem:[%s3380_s0 + $0xa0] sm:$0xff] }
   0x7   :  { %1561 = vmatprep.subr.mxu0 %v2047_v0  ;;  %1807 = vmatprep.subr.mxu1 %v2047_v0  ;;  %v29_v17 = vld [vmem:[%s3380_s0 + $0x30] sm:$0xff]  ;;  %v30_v19 = vld [vmem:[%s3380_s0 + $0x38] sm:$0xff]  ;;  %v31_v21 = vld [vmem:[%s3380_s0 + $0x40] sm:$0xff] }
   0x8   :  { %1562 = vmatpush3.msra.mxu0 %v17_v4  ;;  %1811 = vmatpush3.msra.mxu1 %v17_v4  ;;  %v44_v22 = vld [vmem:[%s3380_s0 + $0xa8] sm:$0xff]  ;;  %v45_v24 = vld [vmem:[%s3380_s0 + $0xb0] sm:$0xff]  ;;  %v46_v26 = vld [vmem:[%s3380_s0 + $0xb8] sm:$0xff] }
   0x9   :  { %1563 = vmatprep.mubr.msk.f32.mxu0 %vm2048_vm1, %v2047_v0  ;;  %1602 = vmatprep.mubr.msk.f32.mxu1 %vm2048_vm1, %v2047_v0  ;;  %v32_v23 = vld [vmem:[%s3380_s0 + $0x48] sm:$0xff]  ;;  %v33_v25 = vld [vmem:[%s3380_s0 + $0x50] sm:$0xff]  ;;  %v34_v27 = vld [vmem:[%s3380_s0 + $0x58] sm:$0xff] }
   0xa   :  { %1564 = vmatmul.mubr.msk.f32.vlgmr.msra.gmra.mxu0 %vm54_vm0, %v23_v5  ;;  %1603 = vmatmul.mubr.msk.f32.vlgmr.msra.gmra.mxu1 %vm54_vm0, %v36_v6  ;;  %v47_v28 = vld [vmem:[%s3380_s0 + $0xc0] sm:$0xff]  ;;  %v1368_v30 = vld [vmem:[%s3380_s0 + $0xc8] sm:$0xff]  ;;  %v1369_v31 = vld [vmem:[%s3380_s0 + $0xd0] sm:$0xff] }
   0xb   :  { %1721 = vmatprep.subr.mxu0 %v2047_v0  ;;  %1638 = vmatprep.subr.mxu1 %v2047_v0  ;;  %v35_v29 = vld [vmem:[%s3380_s0 + $0x60] sm:$0xff]  ;;  %v1418_v32 = vld [vmem:[%s3380_s0 + $0x190] sm:$0xff]  ;;  %v1370_v33 = vld [vmem:[%s3380_s0 + $0xd8] sm:$0xff] }
   0xc   :  { %1722 = vmatpush3.msra.mxu0 %v20_v1  ;;  %1566 = vmatprep.mubr.msk.f32.mxu0 %vm2048_vm1, %v2047_v0  ;;  %v1419_v34 = vld [vmem:[%s3380_s0 + $0x198] sm:$0xff]  ;;  %v1371_v35 = vld [vmem:[%s3380_s0 + $0xe0] sm:$0xff]  ;;  %v1372_v37 = vld [vmem:[%s3380_s0 + $0xe8] sm:$0xff] }
   0xd   :  { %1605 = vmatprep.mubr.msk.f32.mxu1 %vm2048_vm1, %v2047_v0  ;;  %1639 = vmatpush3.msra.mxu1 %v20_v1  ;;  %v1420_v36 = vld [vmem:[%s3380_s0 + $0x1a0] sm:$0xff]  ;;  %v1421_v38 = vld [vmem:[%s3380_s0 + $0x1a8] sm:$0xff]  ;;  %v1373_v39 = vld [vmem:[%s3380_s0 + $0xf0] sm:$0xff] }
   0xe   :  { %1567 = vmatmul.mubr.msk.f32.gmra.mxu0 %vm54_vm0, %v24_v7  ;;  %1606 = vmatmul.mubr.msk.f32.gmra.mxu1 %vm54_vm0, %v37_v8  ;;  %v1422_v40 = vld [vmem:[%s3380_s0 + $0x1b0] sm:$0xff]  ;;  %v1374_v41 = vld [vmem:[%s3380_s0 + $0xf8] sm:$0xff]  ;;  %v1375_v43 = vld [vmem:[%s3380_s0 + $0x100] sm:$0xff] }
   0xf   :  { %1569 = vmatprep.mubr.msk.f32.mxu0 %vm2048_vm1, %v2047_v0  ;;  %1608 = vmatprep.mubr.msk.f32.mxu1 %vm2048_vm1, %v2047_v0  ;;  %v1423_v42 = vld [vmem:[%s3380_s0 + $0x1b8] sm:$0xff]  ;;  %v1424_v44 = vld [vmem:[%s3380_s0 + $0x1c0] sm:$0xff]  ;;  %v1376_v45 = vld [vmem:[%s3380_s0 + $0x108] sm:$0xff] }
  0x10   :  { %1723 = vmatprep.subr.mxu0 %v2047_v0  ;;  %1640 = vmatprep.subr.mxu1 %v2047_v0  ;;  %v1425_v46 = vld [vmem:[%s3380_s0 + $0x1c8] sm:$0xff]  ;;  %v1377_v47 = vld [vmem:[%s3380_s0 + $0x110] sm:$0xff]  ;;  %v1378_v49 = vld [vmem:[%s3380_s0 + $0x118] sm:$0xff] }
  0x11   :  { %1724 = vmatpush3.msra.mxu0 %v19_v2  ;;  %1641 = vmatpush3.msra.mxu1 %v19_v2  ;;  %v1426_v48 = vld [vmem:[%s3380_s0 + $0x1d0] sm:$0xff]  ;;  %v1427_v50 = vld [vmem:[%s3380_s0 + $0x1d8] sm:$0xff]  ;;  %v1379_v51 = vld [vmem:[%s3380_s0 + $0x120] sm:$0xff] }
  0x12   :  { %1570 = vmatmul.mubr.msk.f32.gmra.mxu0 %vm54_vm0, %v25_v9  ;;  %1609 = vmatmul.mubr.msk.f32.gmra.mxu1 %vm54_vm0, %v38_v10  ;;  %v1428_v52 = vld [vmem:[%s3380_s0 + $0x1e0] sm:$0xff]  ;;  %v1380_v53 = vld [vmem:[%s3380_s0 + $0x128] sm:$0xff]  ;;  %v1381_v55 = vld [vmem:[%s3380_s0 + $0x130] sm:$0xff] }
  0x13   :  { %1572 = vmatprep.mubr.msk.f32.mxu0 %vm2048_vm1, %v2047_v0  ;;  %1611 = vmatprep.mubr.msk.f32.mxu1 %vm2048_vm1, %v2047_v0  ;;  %v1429_v54 = vld [vmem:[%s3380_s0 + $0x1e8] sm:$0xff]  ;;  %v1430_v56 = vld [vmem:[%s3380_s0 + $0x1f0] sm:$0xff]  ;;  %v1382_v57 = vld [vmem:[%s3380_s0 + $0x138] sm:$0xff] }
  0x14   :  { %1642 = vmatprep.subr.mxu1 %v2047_v0  ;;  %1725 = vmatprep.subr.mxu0 %v2047_v0  ;;  %v1431_v58 = vld [vmem:[%s3380_s0 + $0x1f8] sm:$0xff]  ;;  %v1383_v59 = vld [vmem:[%s3380_s0 + $0x140] sm:$0xff]  ;;  %v1384_v61 = vld [vmem:[%s3380_s0 + $0x148] sm:$0xff] }
  0x15   :  { %1643 = vmatpush3.msra.mxu1 %v18_v3  ;;  %1726 = vmatpush3.msra.mxu0 %v18_v3  ;;  %v1432_v60 = vld [vmem:[%s3380_s0 + $0x200] sm:$0xff]  ;;  %v1433_v62 = vld [vmem:[%s3380_s0 + $0x208] sm:$0xff]  ;;  %v1385_v63 = vld [vmem:[%s3380_s0 + $0x150] sm:$0xff] }
  0x16   :  { %1573 = vmatmul.mubr.msk.f32.gmra.mxu0 %vm54_vm0, %v26_v11  ;;  %1612 = vmatmul.mubr.msk.f32.gmra.mxu1 %vm54_vm0, %v39_v12  ;;  %v1434_v1 = vld [vmem:[%s3380_s0 + $0x210] sm:$0xff]  ;;  %v1386_v2 = vld [vmem:[%s3380_s0 + $0x158] sm:$0xff]  ;;  %v1436_v5 = vld [vmem:[%s3380_s0 + $0x220] sm:$0xff] }
  0x17   :  { %1575 = vmatprep.mubr.msk.f32.mxu0 %vm2048_vm1, %v2047_v0  ;;  %1614 = vmatprep.mubr.msk.f32.mxu1 %vm2048_vm1, %v2047_v0  ;;  %v1435_v3 = vld [vmem:[%s3380_s0 + $0x218] sm:$0xff]  ;;  %v1388_v6 = vld [vmem:[%s3380_s0 + $0x168] sm:$0xff]  ;;  %v1389_v8 = vld [vmem:[%s3380_s0 + $0x170] sm:$0xff] }
  0x18   :  { %1644 = vmatprep.subr.mxu1 %v2047_v0  ;;  %1727 = vmatprep.subr.mxu0 %v2047_v0  ;;  %v1437_v7 = vld [vmem:[%s3380_s0 + $0x228] sm:$0xff]  ;;  %v1438_v9 = vld [vmem:[%s3380_s0 + $0x230] sm:$0xff]  ;;  %v1390_v10 = vld [vmem:[%s3380_s0 + $0x178] sm:$0xff] }
  0x19   :  { %1645 = vmatpush3.msra.mxu1 %v17_v4  ;;  %1728 = vmatpush3.msra.mxu0 %v17_v4  ;;  %v1387_v4 = vld [vmem:[%s3380_s0 + $0x160] sm:$0xff]  ;;  %v1439_v11 = vld [vmem:[%s3380_s0 + $0x238] sm:$0xff] }
  0x1a   :  { %1576 = vmatmul.mubr.msk.f32.gmra.mxu0 %vm54_vm0, %v27_v13  ;;  %1615 = vmatmul.mubr.msk.f32.gmra.mxu1 %vm54_vm0, %v40_v14  ;;  %v1391_v12 = vld [vmem:[%s3380_s0 + $0x180] sm:$0xff]  ;;  %v1392_v14 = vld [vmem:[%s3380_s0 + $0x188] sm:$0xff] }
  0x1b   :  { %1578 = vmatprep.mubr.msk.f32.mxu0 %vm2048_vm1, %v2047_v0  ;;  %1617 = vmatprep.mubr.msk.f32.mxu1 %vm2048_vm1, %v2047_v0  ;;  %v1440_v13 = vld [vmem:[%s3380_s0 + $0x240] sm:$0xff] }
  0x1e   :  { %1579 = vmatmul.mubr.msk.f32.gmra.mxu0 %vm54_vm0, %v28_v15  ;;  %1618 = vmatmul.mubr.msk.f32.gmra.mxu1 %vm54_vm0, %v41_v16  ;;  %v1441_v15 = vld [vmem:[%s3380_s0 + $0x248] sm:$0xff]  ;;  %v1442_v16 = vld [vmem:[%s3380_s0 + $0x250] sm:$0xff] }
  0x1f   :  { %1581 = vmatprep.mubr.msk.f32.mxu0 %vm2048_vm1, %v2047_v0  ;;  %1620 = vmatprep.mubr.msk.f32.mxu1 %vm2048_vm1, %v2047_v0 }
  0x22   :  { %1582 = vmatmul.mubr.msk.f32.gmra.mxu0 %vm54_vm0, %v29_v17  ;;  %1621 = vmatmul.mubr.msk.f32.gmra.mxu1 %vm54_vm0, %v42_v18 }
  0x23   :  { %1584 = vmatprep.mubr.msk.f32.mxu0 %vm2048_vm1, %v2047_v0  ;;  %1623 = vmatprep.mubr.msk.f32.mxu1 %vm2048_vm1, %v2047_v0 }
  0x26   :  { %1585 = vmatmul.mubr.msk.f32.gmra.mxu0 %vm54_vm0, %v30_v19  ;;  %1624 = vmatmul.mubr.msk.f32.gmra.mxu1 %vm54_vm0, %v43_v20 }
  0x27   :  { %1587 = vmatprep.mubr.msk.f32.mxu0 %vm2048_vm1, %v2047_v0  ;;  %1626 = vmatprep.mubr.msk.f32.mxu1 %vm2048_vm1, %v2047_v0 }
  0x2a   :  { %1588 = vmatmul.mubr.msk.f32.gmra.mxu0 %vm54_vm0, %v31_v21  ;;  %1627 = vmatmul.mubr.msk.f32.gmra.mxu1 %vm54_vm0, %v44_v22 }
  0x2b   :  { %1590 = vmatprep.mubr.msk.f32.mxu0 %vm2048_vm1, %v2047_v0  ;;  %1629 = vmatprep.mubr.msk.f32.mxu1 %vm2048_vm1, %v2047_v0 }
  0x2e   :  { %1591 = vmatmul.mubr.msk.f32.gmra.mxu0 %vm54_vm0, %v32_v23  ;;  %1630 = vmatmul.mubr.msk.f32.gmra.mxu1 %vm54_vm0, %v45_v24 }
  0x2f   :  { %1593 = vmatprep.mubr.msk.f32.mxu0 %vm2048_vm1, %v2047_v0  ;;  %1632 = vmatprep.mubr.msk.f32.mxu1 %vm2048_vm1, %v2047_v0 }
  0x32   :  { %1594 = vmatmul.mubr.msk.f32.gmra.mxu0 %vm54_vm0, %v33_v25  ;;  %1633 = vmatmul.mubr.msk.f32.gmra.mxu1 %vm54_vm0, %v46_v26 }
  0x33   :  { %1596 = vmatprep.mubr.msk.f32.mxu0 %vm2048_vm1, %v2047_v0  ;;  %1635 = vmatprep.mubr.msk.f32.mxu1 %vm2048_vm1, %v2047_v0 }
  0x36   :  { %1597 = vmatmul.mubr.msk.f32.gmra.mxu0 %vm54_vm0, %v34_v27  ;;  %1636 = vmatmul.mubr.msk.f32.gmra.mxu1 %vm54_vm0, %v47_v28 }
  0x37   :  { %1599 = vmatprep.mubr.msk.f32.mxu0 %vm2048_vm1, %v2047_v0  ;;  %1646 = vmatprep.mubr.msk.f32.mxu1 %vm2048_vm1, %v2047_v0 }
  0x3a   :  { %1600 = vmatmul.mubr.msk.f32.gmra.mxu0 %vm54_vm0, %v35_v29  ;;  %1647 = vmatmul.mubr.msk.f32.vlgmr.msra.gmra.mxu1 %vm54_vm0, %v1368_v30 }
  0x3b   :  { %1649 = vmatprep.mubr.msk.f32.mxu1 %vm2048_vm1, %v2047_v0  ;;  %1729 = vmatprep.mubr.msk.f32.mxu0 %vm2048_vm1, %v2047_v0 }
  0x3e   :  { %1650 = vmatmul.mubr.msk.f32.gmra.mxu1 %vm54_vm0, %v1369_v31  ;;  %1730 = vmatmul.mubr.msk.f32.vlgmr.msra.gmra.mxu0 %vm54_vm0, %v1418_v32 }
  0x3f   :  { %1652 = vmatprep.mubr.msk.f32.mxu1 %vm2048_vm1, %v2047_v0  ;;  %1732 = vmatprep.mubr.msk.f32.mxu0 %vm2048_vm1, %v2047_v0 }
  0x42   :  { %1653 = vmatmul.mubr.msk.f32.gmra.mxu1 %vm54_vm0, %v1370_v33  ;;  %1733 = vmatmul.mubr.msk.f32.gmra.mxu0 %vm54_vm0, %v1419_v34 }
  0x43   :  { %1655 = vmatprep.mubr.msk.f32.mxu1 %vm2048_vm1, %v2047_v0  ;;  %1735 = vmatprep.mubr.msk.f32.mxu0 %vm2048_vm1, %v2047_v0 }
  0x46   :  { %1656 = vmatmul.mubr.msk.f32.gmra.mxu1 %vm54_vm0, %v1371_v35  ;;  %1736 = vmatmul.mubr.msk.f32.gmra.mxu0 %vm54_vm0, %v1420_v36  ;;  %v2565_v36 = vld [vmem:[%s3381_s2] ss:$0 sm:$0xff] }
  0x47   :  { %1658 = vmatprep.mubr.msk.f32.mxu1 %vm2048_vm1, %v2047_v0  ;;  %1738 = vmatprep.mubr.msk.f32.mxu0 %vm2048_vm1, %v2047_v0 }
  0x4a   :  { %1659 = vmatmul.mubr.msk.f32.gmra.mxu1 %vm54_vm0, %v1372_v37  ;;  %1739 = vmatmul.mubr.msk.f32.gmra.mxu0 %vm54_vm0, %v1421_v38 }
  0x4b   :  { %1661 = vmatprep.mubr.msk.f32.mxu1 %vm2048_vm1, %v2047_v0  ;;  %1741 = vmatprep.mubr.msk.f32.mxu0 %vm2048_vm1, %v2047_v0 }
  0x4e   :  { %1662 = vmatmul.mubr.msk.f32.gmra.mxu1 %vm54_vm0, %v1373_v39  ;;  %1742 = vmatmul.mubr.msk.f32.gmra.mxu0 %vm54_vm0, %v1422_v40 }
  0x4f   :  { %1664 = vmatprep.mubr.msk.f32.mxu1 %vm2048_vm1, %v2047_v0  ;;  %1744 = vmatprep.mubr.msk.f32.mxu0 %vm2048_vm1, %v2047_v0 }
  0x52   :  { %1665 = vmatmul.mubr.msk.f32.gmra.mxu1 %vm54_vm0, %v1374_v41  ;;  %1745 = vmatmul.mubr.msk.f32.gmra.mxu0 %vm54_vm0, %v1423_v42 }
  0x53   :  { %1667 = vmatprep.mubr.msk.f32.mxu1 %vm2048_vm1, %v2047_v0  ;;  %1747 = vmatprep.mubr.msk.f32.mxu0 %vm2048_vm1, %v2047_v0 }
  0x56   :  { %1668 = vmatmul.mubr.msk.f32.gmra.mxu1 %vm54_vm0, %v1375_v43  ;;  %1748 = vmatmul.mubr.msk.f32.gmra.mxu0 %vm54_vm0, %v1424_v44 }
  0x57   :  { %1670 = vmatprep.mubr.msk.f32.mxu1 %vm2048_vm1, %v2047_v0  ;;  %1750 = vmatprep.mubr.msk.f32.mxu0 %vm2048_vm1, %v2047_v0 }
  0x5a   :  { %1671 = vmatmul.mubr.msk.f32.gmra.mxu1 %vm54_vm0, %v1376_v45  ;;  %1751 = vmatmul.mubr.msk.f32.gmra.mxu0 %vm54_vm0, %v1425_v46 }
  0x5b   :  { %1673 = vmatprep.mubr.msk.f32.mxu1 %vm2048_vm1, %v2047_v0  ;;  %1753 = vmatprep.mubr.msk.f32.mxu0 %vm2048_vm1, %v2047_v0 }
  0x5e   :  { %1674 = vmatmul.mubr.msk.f32.gmra.mxu1 %vm54_vm0, %v1377_v47  ;;  %1754 = vmatmul.mubr.msk.f32.gmra.mxu0 %vm54_vm0, %v1426_v48 }
  0x5f   :  { %1676 = vmatprep.mubr.msk.f32.mxu1 %vm2048_vm1, %v2047_v0  ;;  %1756 = vmatprep.mubr.msk.f32.mxu0 %vm2048_vm1, %v2047_v0 }
  0x62   :  { %1677 = vmatmul.mubr.msk.f32.gmra.mxu1 %vm54_vm0, %v1378_v49  ;;  %1757 = vmatmul.mubr.msk.f32.gmra.mxu0 %vm54_vm0, %v1427_v50 }
  0x63   :  { %1679 = vmatprep.mubr.msk.f32.mxu1 %vm2048_vm1, %v2047_v0  ;;  %1759 = vmatprep.mubr.msk.f32.mxu0 %vm2048_vm1, %v2047_v0 }
  0x66   :  { %1680 = vmatmul.mubr.msk.f32.gmra.mxu1 %vm54_vm0, %v1379_v51  ;;  %1760 = vmatmul.mubr.msk.f32.gmra.mxu0 %vm54_vm0, %v1428_v52 }
  0x67   :  { %1682 = vmatprep.mubr.msk.f32.mxu1 %vm2048_vm1, %v2047_v0  ;;  %1762 = vmatprep.mubr.msk.f32.mxu0 %vm2048_vm1, %v2047_v0 }
  0x6a   :  { %1683 = vmatmul.mubr.msk.f32.gmra.mxu1 %vm54_vm0, %v1380_v53  ;;  %1763 = vmatmul.mubr.msk.f32.gmra.mxu0 %vm54_vm0, %v1429_v54 }
  0x6b   :  { %1685 = vmatprep.mubr.msk.f32.mxu1 %vm2048_vm1, %v2047_v0  ;;  %1765 = vmatprep.mubr.msk.f32.mxu0 %vm2048_vm1, %v2047_v0 }
  0x6e   :  { %1686 = vmatmul.mubr.msk.f32.gmra.mxu1 %vm54_vm0, %v1381_v55  ;;  %1766 = vmatmul.mubr.msk.f32.gmra.mxu0 %vm54_vm0, %v1430_v56 }
  0x6f   :  { %1688 = vmatprep.mubr.msk.f32.mxu1 %vm2048_vm1, %v2047_v0  ;;  %1768 = vmatprep.mubr.msk.f32.mxu0 %vm2048_vm1, %v2047_v0 }
  0x72   :  { %1689 = vmatmul.mubr.msk.f32.gmra.mxu1 %vm54_vm0, %v1382_v57  ;;  %1769 = vmatmul.mubr.msk.f32.gmra.mxu0 %vm54_vm0, %v1431_v58 }
  0x73   :  { %1691 = vmatprep.mubr.msk.f32.mxu1 %vm2048_vm1, %v2047_v0  ;;  %1771 = vmatprep.mubr.msk.f32.mxu0 %vm2048_vm1, %v2047_v0 }
  0x76   :  { %1692 = vmatmul.mubr.msk.f32.gmra.mxu1 %vm54_vm0, %v1383_v59  ;;  %1772 = vmatmul.mubr.msk.f32.gmra.mxu0 %vm54_vm0, %v1432_v60 }
  0x77   :  { %1694 = vmatprep.mubr.msk.f32.mxu1 %vm2048_vm1, %v2047_v0  ;;  %1774 = vmatprep.mubr.msk.f32.mxu0 %vm2048_vm1, %v2047_v0 }
  0x7a   :  { %1695 = vmatmul.mubr.msk.f32.gmra.mxu1 %vm54_vm0, %v1384_v61  ;;  %1775 = vmatmul.mubr.msk.f32.gmra.mxu0 %vm54_vm0, %v1433_v62 }
  0x7b   :  { %1697 = vmatprep.mubr.msk.f32.mxu1 %vm2048_vm1, %v2047_v0  ;;  %1777 = vmatprep.mubr.msk.f32.mxu0 %vm2048_vm1, %v2047_v0 }
  0x7e   :  { %1698 = vmatmul.mubr.msk.f32.gmra.mxu1 %vm54_vm0, %v1385_v63  ;;  %1778 = vmatmul.mubr.msk.f32.gmra.mxu0 %vm54_vm0, %v1434_v1 }
  0x7f   :  { %1700 = vmatprep.mubr.msk.f32.mxu1 %vm2048_vm1, %v2047_v0  ;;  %1780 = vmatprep.mubr.msk.f32.mxu0 %vm2048_vm1, %v2047_v0 }
  0x82   :  { %1701 = vmatmul.mubr.msk.f32.gmra.mxu1 %vm54_vm0, %v1386_v2  ;;  %1781 = vmatmul.mubr.msk.f32.gmra.mxu0 %vm54_vm0, %v1435_v3 }
  0x83   :  { %1703 = vmatprep.mubr.msk.f32.mxu1 %vm2048_vm1, %v2047_v0  ;;  %1783 = vmatprep.mubr.msk.f32.mxu0 %vm2048_vm1, %v2047_v0 }
  0x86   :  { %1704 = vmatmul.mubr.msk.f32.gmra.mxu1 %vm54_vm0, %v1387_v4  ;;  %1784 = vmatmul.mubr.msk.f32.gmra.mxu0 %vm54_vm0, %v1436_v5 }
  0x87   :  { %1706 = vmatprep.mubr.msk.f32.mxu1 %vm2048_vm1, %v2047_v0  ;;  %1786 = vmatprep.mubr.msk.f32.mxu0 %vm2048_vm1, %v2047_v0 }
  0x8a   :  { %1707 = vmatmul.mubr.msk.f32.gmra.mxu1 %vm54_vm0, %v1388_v6  ;;  %1787 = vmatmul.mubr.msk.f32.gmra.mxu0 %vm54_vm0, %v1437_v7 }
  0x8b   :  { %1709 = vmatprep.mubr.msk.f32.mxu1 %vm2048_vm1, %v2047_v0  ;;  %1789 = vmatprep.mubr.msk.f32.mxu0 %vm2048_vm1, %v2047_v0 }
  0x8e   :  { %1710 = vmatmul.mubr.msk.f32.gmra.mxu1 %vm54_vm0, %v1389_v8  ;;  %1790 = vmatmul.mubr.msk.f32.gmra.mxu0 %vm54_vm0, %v1438_v9 }
  0x8f   :  { %1712 = vmatprep.mubr.msk.f32.mxu1 %vm2048_vm1, %v2047_v0  ;;  %1792 = vmatprep.mubr.msk.f32.mxu0 %vm2048_vm1, %v2047_v0 }
  0x92   :  { %1713 = vmatmul.mubr.msk.f32.gmra.mxu1 %vm54_vm0, %v1390_v10  ;;  %1793 = vmatmul.mubr.msk.f32.gmra.mxu0 %vm54_vm0, %v1439_v11 }
  0x93   :  { %1715 = vmatprep.mubr.msk.f32.mxu1 %vm2048_vm1, %v2047_v0  ;;  %1795 = vmatprep.mubr.msk.f32.mxu0 %vm2048_vm1, %v2047_v0 }
  0x96   :  { %1716 = vmatmul.mubr.msk.f32.gmra.mxu1 %vm54_vm0, %v1391_v12  ;;  %1796 = vmatmul.mubr.msk.f32.gmra.mxu0 %vm54_vm0, %v1440_v13 }
  0x97   :  { %1718 = vmatprep.mubr.msk.f32.mxu1 %vm2048_vm1, %v2047_v0  ;;  %1798 = vmatprep.mubr.msk.f32.mxu0 %vm2048_vm1, %v2047_v0 }
  0x9a   :  { %1719 = vmatmul.mubr.msk.f32.gmra.mxu1 %vm54_vm0, %v1392_v14  ;;  %1799 = vmatmul.mubr.msk.f32.gmra.mxu0 %vm54_vm0, %v1441_v15 }
  0x9b   :  { %1801 = vmatprep.mubr.msk.f32.mxu0 %vm2048_vm1, %v2047_v0 }
  0x9e   :  { %1802 = vmatmul.mubr.msk.f32.gmra.mxu0 %vm54_vm0, %v1442_v16 }
  0xca   :  { %v196_v17 = vpop.f32.mrf.mxu0  ;;  %v2552_v18 = vpop.f32.mrf.mxu1 }
  0xcb   :  { %v197_v40 = vadd.f32 %v2565_v36, %v196_v17 }
  0xcc   :  { %v1565_v19 = vpop.f32.mrf.mxu0  ;;  %v1604_v20 = vpop.f32.mrf.mxu1 }
  0xce   :  { %v201_v21 = vpop.f32.mrf.mxu0  ;;  %v2554_v22 = vpop.f32.mrf.mxu1 }
  0xcf   :  { %v202_v39 = vadd.f32 %v2565_v36, %v201_v21 }
  0xd0   :  { %v1568_v23 = vpop.f32.mrf.mxu0  ;;  %v1607_v24 = vpop.f32.mrf.mxu1 }
  0xd1   :  { %1814 = vtanh.f32 %v202_v39 }
  0xd2   :  { %v206_v25 = vpop.f32.mrf.mxu0  ;;  %v2556_v26 = vpop.f32.mrf.mxu1  ;;  %1816 = vtanh.f32 %v197_v40 }
  0xd3   :  { %v207_v43 = vadd.f32 %v2565_v36, %v206_v25  ;;  %v262_v25 = vadd.f32 %v2565_v36, %v2552_v18 }
  0xd4   :  { %v1571_v0 = vpop.f32.mrf.mxu0  ;;  %v1610_v27 = vpop.f32.mrf.mxu1 }
  0xd5   :  { %1818 = vtanh.f32 %v207_v43 }
  0xd6   :  { %v211_v28 = vpop.f32.mrf.mxu0  ;;  %v2558_v29 = vpop.f32.mrf.mxu1 }
  0xd7   :  { %v212_v46 = vadd.f32 %v2565_v36, %v211_v28 }
  0xd8   :  { %v1574_v30 = vpop.f32.mrf.mxu0  ;;  %v1613_v31 = vpop.f32.mrf.mxu1 }
  0xd9   :  { %1820 = vtanh.f32 %v212_v46 }
  0xda   :  { %v216_v32 = vpop.f32.mrf.mxu0  ;;  %v2560_v33 = vpop.f32.mrf.mxu1 }
  0xdb   :  { %v217_v49 = vadd.f32 %v2565_v36, %v216_v32 }
  0xdc   :  { %v1577_v34 = vpop.f32.mrf.mxu0  ;;  %v1616_v35 = vpop.f32.mrf.mxu1 }
  0xdd   :  { %1822 = vtanh.f32 %v217_v49 }
  0xde   :  { %v221_v37 = vpop.f32.mrf.mxu0  ;;  %v2567_v38 = vpop.f32.mrf.mxu1 }
  0xdf   :  { %v222_v52 = vadd.f32 %v2565_v36, %v221_v37  ;;  %v1815_v2 = vpop.eup %1814  ;;  %v267_v37 = vadd.f32 %v2565_v36, %v2554_v22 }
  0xe0   :  { %v1580_v41 = vpop.f32.mrf.mxu0  ;;  %v1619_v42 = vpop.f32.mrf.mxu1  ;;  %v346_v9 = vsel %vm54_vm0, %v1815_v2, 0.0 }
  0xe1   :  { %1824 = vtanh.f32 %v222_v52  ;;  %v1817_v5 = vpop.eup %1816 }
  0xe2   :  { %v226_v44 = vpop.f32.mrf.mxu0  ;;  %v2572_v45 = vpop.f32.mrf.mxu1  ;;  %v345_v14 = vsel %vm54_vm0, %v1817_v5, 0.0 }
  0xe3   :  { %v227_v55 = vadd.f32 %v2565_v36, %v226_v44  ;;  %v1819_v6 = vpop.eup %1818  ;;  %v347_v17 = vadd.f32 %v346_v9, %v345_v14  ;;  %v272_v44 = vadd.f32 %v2565_v36, %v2556_v26  ;;  %v282_v26 = vadd.f32 %v2565_v36, %v2560_v33 }
  0xe4   :  { %v1583_v47 = vpop.f32.mrf.mxu0  ;;  %v1622_v48 = vpop.f32.mrf.mxu1  ;;  %v348_v15 = vsel %vm54_vm0, %v1819_v6, 0.0  ;;  %v292_v33 = vadd.f32 %v2565_v36, %v2572_v45 }
  0xe5   :  { %1826 = vtanh.f32 %v227_v55  ;;  %v349_v0 = vadd.f32 %v348_v15, %v347_v17 }
  0xe6   :  { %v231_v50 = vpop.f32.mrf.mxu0  ;;  %v2576_v51 = vpop.f32.mrf.mxu1 }
  0xe7   :  { %v232_v58 = vadd.f32 %v2565_v36, %v231_v50  ;;  %v1821_v11 = vpop.eup %1820  ;;  %v277_v50 = vadd.f32 %v2565_v36, %v2558_v29  ;;  %v287_v29 = vadd.f32 %v2565_v36, %v2567_v38  ;;  %v297_v38 = vadd.f32 %v2565_v36, %v2576_v51 }
  0xe8   :  { %v1586_v53 = vpop.f32.mrf.mxu0  ;;  %v1625_v54 = vpop.f32.mrf.mxu1  ;;  %v350_v21 = vsel %vm54_vm0, %v1821_v11, 0.0 }
  0xe9   :  { %1828 = vtanh.f32 %v232_v58  ;;  %v351_v32 = vadd.f32 %v350_v21, %v349_v0 }
  0xea   :  { %v236_v56 = vpop.f32.mrf.mxu0  ;;  %v2580_v57 = vpop.f32.mrf.mxu1 }
  0xeb   :  { %v237_v61 = vadd.f32 %v2565_v36, %v236_v56  ;;  %v1823_v16 = vpop.eup %1822  ;;  %v302_v45 = vadd.f32 %v2565_v36, %v2580_v57 }
  0xec   :  { %v1589_v59 = vpop.f32.mrf.mxu0  ;;  %v1628_v60 = vpop.f32.mrf.mxu1  ;;  %v352_v30 = vsel %vm54_vm0, %v1823_v16, 0.0 }
  0xed   :  { %1830 = vtanh.f32 %v237_v61  ;;  %v353_v18 = vadd.f32 %v352_v30, %v351_v32 }
  0xee   :  { %v241_v62 = vpop.f32.mrf.mxu0  ;;  %v2584_v63 = vpop.f32.mrf.mxu1 }
  0xef   :  { %v242_v1 = vadd.f32 %v2565_v36, %v241_v62  ;;  %v1825_v24 = vpop.eup %1824  ;;  %v307_v51 = vadd.f32 %v2565_v36, %v2584_v63 }
  0xf0   :  { %v1592_v3 = vpop.f32.mrf.mxu0  ;;  %v1631_v4 = vpop.f32.mrf.mxu1  ;;  %v354_v39 = vsel %vm54_vm0, %v1825_v24, 0.0 }
  0xf1   :  { %1832 = vtanh.f32 %v242_v1  ;;  %v355_v48 = vadd.f32 %v354_v39, %v353_v18 }
  0xf2   :  { %v246_v7 = vpop.f32.mrf.mxu0  ;;  %v2587_v8 = vpop.f32.mrf.mxu1 }
  0xf3   :  { %v247_v10 = vadd.f32 %v2565_v36, %v246_v7  ;;  %v1827_v31 = vpop.eup %1826  ;;  %v312_v57 = vadd.f32 %v2565_v36, %v2587_v8 }
  0xf4   :  { %v1595_v12 = vpop.f32.mrf.mxu0  ;;  %v1634_v13 = vpop.f32.mrf.mxu1  ;;  %v356_v46 = vsel %vm54_vm0, %v1827_v31, 0.0 }
  0xf5   :  { %1834 = vtanh.f32 %v247_v10  ;;  %v357_v54 = vadd.f32 %v356_v46, %v355_v48 }
  0xf6   :  { %v251_v19 = vpop.f32.mrf.mxu0  ;;  %v2593_v20 = vpop.f32.mrf.mxu1 }
  0xf7   :  { %v252_v23 = vadd.f32 %v2565_v36, %v251_v19  ;;  %v1829_v41 = vpop.eup %1828 }
  0xf8   :  { %v1598_v27 = vpop.f32.mrf.mxu0  ;;  %v1637_v28 = vpop.f32.mrf.mxu1  ;;  %v358_v52 = vsel %vm54_vm0, %v1829_v41, 0.0 }
  0xf9   :  { %1836 = vtanh.f32 %v252_v23  ;;  %v359_v60 = vadd.f32 %v358_v52, %v357_v54 }
  0xfa   :  { %v256_v34 = vpop.f32.mrf.mxu0  ;;  %v2600_v35 = vpop.f32.mrf.mxu1  ;;  %1838 = vtanh.f32 %v262_v25 }
  0xfb   :  { %v257_v40 = vadd.f32 %v2565_v36, %v256_v34  ;;  %v1831_v47 = vpop.eup %1830 }
  0xfc   :  { %v1601_v42 = vpop.f32.mrf.mxu0  ;;  %v1648_v43 = vpop.f32.mrf.mxu1  ;;  %v360_v58 = vsel %vm54_vm0, %v1831_v47, 0.0 }
  0xfd   :  { %1840 = vtanh.f32 %v257_v40  ;;  %v361_v2 = vadd.f32 %v360_v58, %v359_v60 }
  0xfe   :  { %v2609_v49 = vpop.f32.mrf.mxu1  ;;  %v2611_v22 = vpop.f32.mrf.mxu0  ;;  %1842 = vtanh.f32 %v267_v37  ;;  %v317_v37 = vadd.f32 %v2565_v36, %v2593_v20 }
  0xff   :  { %v1833_v53 = vpop.eup %1832  ;;  %1844 = vtanh.f32 %v272_v44 }
 0x100   :  { %v1651_v55 = vpop.f32.mrf.mxu1  ;;  %v1731_v56 = vpop.f32.mrf.mxu0  ;;  %1846 = vtanh.f32 %v277_v50  ;;  %v362_v1 = vsel %vm54_vm0, %v1833_v53, 0.0 }
 0x101   :  { %1848 = vtanh.f32 %v282_v26  ;;  %v363_v7 = vadd.f32 %v362_v1, %v361_v2 }
 0x102   :  { %v1835_v59 = vpop.eup %1834  ;;  %v2619_v61 = vpop.f32.mrf.mxu1  ;;  %1850 = vtanh.f32 %v287_v29 }
 0x103   :  { %v2621_v62 = vpop.f32.mrf.mxu0  ;;  %v364_v5 = vsel %vm54_vm0, %v1835_v59, 0.0  ;;  %1852 = vtanh.f32 %v292_v33 }
 0x104   :  { %v1654_v3 = vpop.f32.mrf.mxu1  ;;  %v365_v12 = vadd.f32 %v364_v5, %v363_v7  ;;  %1854 = vtanh.f32 %v297_v38 }
 0x105   :  { %v1734_v4 = vpop.f32.mrf.mxu0  ;;  %1856 = vtanh.f32 %v302_v45 }
 0x106   :  { %v1837_v6 = vpop.eup %1836  ;;  %v2629_v9 = vpop.f32.mrf.mxu1  ;;  %1858 = vtanh.f32 %v307_v51 }
 0x107   :  { %v2631_v10 = vpop.f32.mrf.mxu0  ;;  %v366_v11 = vsel %vm54_vm0, %v1837_v6, 0.0  ;;  %v1839_v15 = vpop.eup %1838  ;;  %1860 = vtanh.f32 %v312_v57 }
 0x108   :  { %v1657_v13 = vpop.f32.mrf.mxu1  ;;  %v367_v17 = vadd.f32 %v366_v11, %v365_v12  ;;  %v370_v28 = vsel %vm54_vm0, %v1839_v15, 0.0  ;;  %1862 = vtanh.f32 %v317_v37 }
 0x109   :  { %v1737_v14 = vpop.f32.mrf.mxu0 }
 0x10a   :  { %v1841_v16 = vpop.eup %1840  ;;  %v2638_v19 = vpop.f32.mrf.mxu1 }
 0x10b   :  { %v2640_v21 = vpop.f32.mrf.mxu0  ;;  %v368_v23 = vsel %vm54_vm0, %v1841_v16, 0.0  ;;  %v1843_v24 = vpop.eup %1842 }
 0x10c   :  { %v369_v25 = vadd.f32 %v368_v23, %v367_v17  ;;  %v1660_v0 = vpop.f32.mrf.mxu1  ;;  %v1845_v30 = vpop.eup %1844  ;;  %v372_v63 = vsel %vm54_vm0, %v1843_v24, 0.0 }
 0x10d   :  { %v1740_v27 = vpop.f32.mrf.mxu0  ;;  %v1847_v39 = vpop.eup %1846  ;;  %v374_v42 = vsel %vm54_vm0, %v1845_v30, 0.0 }
 0x10e   :  { %v371_v31 = vadd.f32 %v370_v28, %v369_v25  ;;  %v2648_v32 = vpop.f32.mrf.mxu1  ;;  %v1849_v8 = vpop.eup %1848  ;;  %v376_v47 = vsel %vm54_vm0, %v1847_v39, 0.0  ;;  %v574_v39 = vadd.f32 %v2565_v36, %v2600_v35  ;;  %v955_v35 = vadd.f32 %v2565_v36, %v2621_v62 }
 0x10f   :  { %v2650_v34 = vpop.f32.mrf.mxu0  ;;  %v1851_v48 = vpop.eup %1850  ;;  %v378_v53 = vsel %vm54_vm0, %v1849_v8, 0.0  ;;  %v950_v8 = vadd.f32 %v2565_v36, %v2611_v22  ;;  %v960_v22 = vadd.f32 %v2565_v36, %v2631_v10  ;;  %v594_v62 = vadd.f32 %v2565_v36, %v2638_v19 }
 0x110   :  { %v373_v40 = vadd.f32 %v372_v63, %v371_v31  ;;  %v1663_v41 = vpop.f32.mrf.mxu1  ;;  %v1853_v54 = vpop.eup %1852  ;;  %v380_v58 = vsel %vm54_vm0, %v1851_v48, 0.0  ;;  %1864 = vtanh.f32 %v574_v39  ;;  %v599_v10 = vadd.f32 %v2565_v36, %v2648_v32 }
 0x111   :  { %v1743_v18 = vpop.f32.mrf.mxu0  ;;  %v1855_v59 = vpop.eup %1854  ;;  %v382_v2 = vsel %vm54_vm0, %v1853_v54, 0.0 }
 0x112   :  { %v375_v43 = vadd.f32 %v374_v42, %v373_v40  ;;  %v2656_v44 = vpop.f32.mrf.mxu1  ;;  %v1857_v3 = vpop.eup %1856  ;;  %v384_v6 = vsel %vm54_vm0, %v1855_v59, 0.0  ;;  %v579_v42 = vadd.f32 %v2565_v36, %v2609_v49  ;;  %v589_v49 = vadd.f32 %v2565_v36, %v2629_v9 }
 0x113   :  { %v2658_v46 = vpop.f32.mrf.mxu0  ;;  %v1859_v7 = vpop.eup %1858  ;;  %v386_v13 = vsel %vm54_vm0, %v1857_v3, 0.0  ;;  %v2724_v3 = vld [vmem:[%s3382_s3] sm:$0x1] }
 0x114   :  { %v377_v50 = vadd.f32 %v376_v47, %v375_v43  ;;  %v1666_v52 = vpop.f32.mrf.mxu1  ;;  %v1861_v14 = vpop.eup %1860  ;;  %v388_v17 = vsel %vm54_vm0, %v1859_v7, 0.0  ;;  %1866 = vtanh.f32 %v579_v42  ;;  %v975_v32 = vadd.f32 %v2565_v36, %v2658_v46 }
 0x115   :  { %v1746_v20 = vpop.f32.mrf.mxu0  ;;  %v1863_v51 = vpop.eup %1862  ;;  %v390_v0 = vsel %vm54_vm0, %v1861_v14, 0.0  ;;  %1868 = vtanh.f32 %v950_v8 }
 0x116   :  { %v2662_v55 = vpop.f32.mrf.mxu1  ;;  %v379_v26 = vadd.f32 %v378_v53, %v377_v50  ;;  %v392_v30 = vsel %vm54_vm0, %v1863_v51, 0.0  ;;  %v584_v50 = vadd.f32 %v2565_v36, %v2619_v61 }
 0x117   :  { %v2664_v56 = vpop.f32.mrf.mxu0  ;;  %v609_v7 = vadd.f32 %v2565_v36, %v2662_v55 }
 0x118   :  { %v1669_v60 = vpop.f32.mrf.mxu1  ;;  %v381_v1 = vadd.f32 %v380_v58, %v379_v26  ;;  %1870 = vtanh.f32 %v584_v50  ;;  %v965_v58 = vadd.f32 %v2565_v36, %v2640_v21  ;;  %v604_v21 = vadd.f32 %v2565_v36, %v2656_v44 }
 0x119   :  { %v1749_v29 = vpop.f32.mrf.mxu0  ;;  %1872 = vtanh.f32 %v955_v35  ;;  %v980_v44 = vadd.f32 %v2565_v36, %v2664_v56 }
 0x11a   :  { %v2668_v4 = vpop.f32.mrf.mxu1  ;;  %v383_v5 = vadd.f32 %v382_v2, %v381_v1  ;;  %1874 = vtanh.f32 %v589_v49  ;;  %v970_v29 = vadd.f32 %v2565_v36, %v2650_v34 }
 0x11b   :  { %v2670_v33 = vpop.f32.mrf.mxu0  ;;  %1876 = vtanh.f32 %v960_v22  ;;  %v614_v46 = vadd.f32 %v2565_v36, %v2668_v4 }
 0x11c   :  { %v1672_v38 = vpop.f32.mrf.mxu1  ;;  %v385_v12 = vadd.f32 %v384_v6, %v383_v5  ;;  %1878 = vtanh.f32 %v594_v62 }
 0x11d   :  { %v1752_v11 = vpop.f32.mrf.mxu0  ;;  %1880 = vtanh.f32 %v965_v58 }
 0x11e   :  { %v2674_v15 = vpop.f32.mrf.mxu1  ;;  %v387_v16 = vadd.f32 %v386_v13, %v385_v12  ;;  %1882 = vtanh.f32 %v599_v10  ;;  %v985_v13 = vadd.f32 %v2565_v36, %v2670_v33 }
 0x11f   :  { %v2676_v45 = vpop.f32.mrf.mxu0  ;;  %1884 = vtanh.f32 %v970_v29  ;;  %v619_v56 = vadd.f32 %v2565_v36, %v2674_v15 }
 0x120   :  { %v1675_v23 = vpop.f32.mrf.mxu1  ;;  %v389_v25 = vadd.f32 %v388_v17, %v387_v16  ;;  %1886 = vtanh.f32 %v604_v21  ;;  %v1865_v17 = vpop.eup %1864  ;;  %v990_v4 = vadd.f32 %v2565_v36, %v2676_v45 }
 0x121   :  { %v1755_v24 = vpop.f32.mrf.mxu0  ;;  %1888 = vtanh.f32 %v975_v32  ;;  %v1867_v51 = vpop.eup %1866 }
 0x122   :  { %v2680_v27 = vpop.f32.mrf.mxu1  ;;  %v391_v57 = vadd.f32 %v390_v0, %v389_v25  ;;  %1890 = vtanh.f32 %v609_v7  ;;  %v1869_v33 = vpop.eup %1868 }
 0x123   :  { %v2682_v28 = vpop.f32.mrf.mxu0  ;;  %1892 = vtanh.f32 %v980_v44  ;;  %v624_v25 = vadd.f32 %v2565_v36, %v2680_v27 }
 0x124   :  { %v1678_v31 = vpop.f32.mrf.mxu1  ;;  %v393_v37 = vadd.f32 %v392_v30, %v391_v57  ;;  %1894 = vtanh.f32 %v614_v46  ;;  %v995_v57 = vadd.f32 %v2565_v36, %v2682_v28  ;;  %v722_v28 = vsel %vm54_vm0, %v1865_v17, 0.0 }
 0x125   :  { %v1758_v63 = vpop.f32.mrf.mxu0  ;;  %v1871_v0 = vpop.eup %1870  ;;  %1896 = vtanh.f32 %v985_v13 }
 0x126   :  { %v2687_v40 = vpop.f32.mrf.mxu1  ;;  %v394_v18 = vrot.slane %v393_v37, 4  ;;  %v1873_v31 = vpop.eup %1872  ;;  %v723_v63 = vsel %vm54_vm0, %v1867_v51, 0.0  ;;  %1898 = vtanh.f32 %v619_v56  ;;  %v725_v8 = vsel %vm54_vm0, %v1871_v0, 0.0 }
 0x127   :  { %v2689_v41 = vpop.f32.mrf.mxu0  ;;  %v629_v45 = vadd.f32 %v2565_v36, %v2687_v40  ;;  %1900 = vtanh.f32 %v990_v4 }
 0x128   :  { %v1681_v43 = vpop.f32.mrf.mxu1  ;;  %v395_v48 = vadd.f32 %v394_v18, %v393_v37  ;;  %v1875_v37 = vpop.eup %1874  ;;  %v1000_v27 = vadd.f32 %v2565_v36, %v2689_v41  ;;  %1902 = vtanh.f32 %v624_v25 }
 0x129   :  { %v1761_v47 = vpop.f32.mrf.mxu0  ;;  %v1877_v42 = vpop.eup %1876  ;;  %1904 = vtanh.f32 %v995_v57  ;;  %v727_v49 = vsel %vm54_vm0, %v1875_v37, 0.0 }
 0x12a   :  { %v2699_v52 = vpop.f32.mrf.mxu1  ;;  %v396_v53 = vrot.slane %v395_v48, 2  ;;  %v1879_v47 = vpop.eup %1878  ;;  %1906 = vtanh.f32 %v629_v45 }
 0x12b   :  { %v2701_v20 = vpop.f32.mrf.mxu0  ;;  %v634_v43 = vadd.f32 %v2565_v36, %v2699_v52  ;;  %v1881_v41 = vpop.eup %1880  ;;  %v1098_v52 = vsel %vm54_vm0, %v1869_v33, 0.0  ;;  %1908 = vtanh.f32 %v1000_v27  ;;  %v729_v10 = vsel %vm54_vm0, %v1879_v47, 0.0 }
 0x12c   :  { %v1684_v54 = vpop.f32.mrf.mxu1  ;;  %v397_v61 = vadd.f32 %v396_v53, %v395_v48  ;;  %v724_v48 = vadd.f32 %v723_v63, %v722_v28  ;;  %v1005_v40 = vadd.f32 %v2565_v36, %v2701_v20  ;;  %v1099_v53 = vsel %vm54_vm0, %v1873_v31, 0.0 }
 0x12d   :  { %v1764_v26 = vpop.f32.mrf.mxu0  ;;  %v1883_v54 = vpop.eup %1882  ;;  %1910 = vtanh.f32 %v634_v43 }
 0x12e   :  { %v2711_v59 = vpop.f32.mrf.mxu1  ;;  %v398_v9 = vrot.slane %v397_v61, 1  ;;  %v726_v26 = vadd.f32 %v725_v8, %v724_v48  ;;  %v1885_v58 = vpop.eup %1884  ;;  %1912 = vtanh.f32 %v1005_v40  ;;  %v731_v7 = vsel %vm54_vm0, %v1883_v54, 0.0 }
 0x12f   :  { %v2713_v60 = vpop.f32.mrf.mxu0  ;;  %v639_v22 = vadd.f32 %v2565_v36, %v2711_v59  ;;  %v1887_v59 = vpop.eup %1886 }
 0x130   :  { %v1687_v1 = vpop.f32.mrf.mxu1  ;;  %v399_v19 = vadd.f32 %v398_v9, %v397_v61  ;;  %v1010_v61 = vadd.f32 %v2565_v36, %v2713_v60  ;;  %v1101_v9 = vsel %vm54_vm0, %v1877_v42, 0.0  ;;  %v1889_v32 = vpop.eup %1888  ;;  %v733_v17 = vsel %vm54_vm0, %v1887_v59, 0.0 }
 0x131   :  { %v1767_v2 = vpop.f32.mrf.mxu0  ;;  %v1100_v1 = vadd.f32 %v1099_v53, %v1098_v52  ;;  %1914 = vtanh.f32 %v639_v22  ;;  %v1107_v25 = vsel %vm54_vm0, %v1889_v32, 0.0 }
 0x132   :  { %v2728_v5 = vpop.f32.mrf.mxu1  ;;  %v400_v34 = vmul.f32 0.005, %v399_v19  ;;  %v728_v2 = vadd.f32 %v727_v49, %v726_v26  ;;  %1916 = vtanh.f32 %v1010_v61 }
 0x133   :  { %v2730_v6 = vpop.f32.mrf.mxu0  ;;  %v644_v29 = vadd.f32 %v2565_v36, %v2728_v5  ;;  %v1102_v5 = vadd.f32 %v1101_v9, %v1100_v1 }
 0x134   :  { %v1690_v38 = vpop.f32.mrf.mxu1  ;;  %v401_v12 = vmul.f32 %v400_v34, %v2724_v3  ;;  %v1015_v19 = vadd.f32 %v2565_v36, %v2730_v6  ;;  %v1103_v34 = vsel %vm54_vm0, %v1881_v41, 0.0 }
 0x135   :  { %v1770_v11 = vpop.f32.mrf.mxu0  ;;  %v1891_v38 = vpop.eup %1890  ;;  %1918 = vtanh.f32 %v644_v29  ;;  %v1104_v4 = vadd.f32 %v1103_v34, %v1102_v5 }
 0x136   :  { %v2741_v14 = vpop.f32.mrf.mxu1  ;;  %v403_v16 = vsel %vm402_vm2, %v401_v12, 0.0  ;;  %v730_v11 = vadd.f32 %v729_v10, %v728_v2  ;;  %v1893_v13 = vpop.eup %1892  ;;  %1920 = vtanh.f32 %v1015_v19  ;;  %v735_v0 = vsel %vm54_vm0, %v1891_v38, 0.0 }
 0x137   :  { %v2743_v55 = vpop.f32.mrf.mxu0  ;;  %404 = vadd.xlane.f32.xlu0 %v403_v16  ;;  %v649_v44 = vadd.f32 %v2565_v36, %v2741_v14  ;;  %v1105_v16 = vsel %vm54_vm0, %v1885_v58, 0.0  ;;  %v1895_v51 = vpop.eup %1894 }
 0x138   :  { %v1693_v23 = vpop.f32.mrf.mxu1  ;;  %v1020_v12 = vadd.f32 %v2565_v36, %v2743_v55  ;;  %v732_v14 = vadd.f32 %v731_v7, %v730_v11  ;;  %v1897_v55 = vpop.eup %1896  ;;  %v1106_v63 = vadd.f32 %v1105_v16, %v1104_v4 }
 0x139   :  { %v1773_v24 = vpop.f32.mrf.mxu0  ;;  %1922 = vtanh.f32 %v649_v44  ;;  %v1899_v31 = vpop.eup %1898 }
 0x13a   :  { %v653_v30 = vpop.f32.mrf.mxu1  ;;  %1924 = vtanh.f32 %v1020_v12  ;;  %v1108_v8 = vadd.f32 %v1107_v25, %v1106_v63  ;;  %v739_v41 = vsel %vm54_vm0, %v1899_v31, 0.0 }
 0x13b   :  { %v2754_v15 = vpop.f32.mrf.mxu0  ;;  %v654_v56 = vadd.f32 %v2565_v36, %v653_v30  ;;  %v734_v30 = vadd.f32 %v733_v17, %v732_v14 }
 0x13c   :  { %v1696_v39 = vpop.f32.mrf.mxu1  ;;  %v1025_v23 = vadd.f32 %v2565_v36, %v2754_v15  ;;  %v1109_v15 = vsel %vm54_vm0, %v1893_v13, 0.0 }
 0x13d   :  { %v1776_v18 = vpop.f32.mrf.mxu0  ;;  %v1901_v39 = vpop.eup %1900  ;;  %1926 = vtanh.f32 %v654_v56  ;;  %v736_v43 = vadd.f32 %v735_v0, %v734_v30  ;;  %v1110_v22 = vadd.f32 %v1109_v15, %v1108_v8 }
 0x13e   :  { %v658_v50 = vpop.f32.mrf.mxu1  ;;  %v737_v18 = vsel %vm54_vm0, %v1895_v51, 0.0  ;;  %v1903_v28 = vpop.eup %1902  ;;  %1928 = vtanh.f32 %v1025_v23 }
 0x13f   :  { %v1029_v35 = vpop.f32.mrf.mxu0  ;;  %v659_v57 = vadd.f32 %v2565_v36, %v658_v50  ;;  %v1905_v50 = vpop.eup %1904  ;;  %v738_v54 = vadd.f32 %v737_v18, %v736_v43  ;;  %v741_v58 = vsel %vm54_vm0, %v1903_v28, 0.0 }
 0x140   :  { %v1699_v20 = vpop.f32.mrf.mxu1  ;;  %v1030_v45 = vadd.f32 %v2565_v36, %v1029_v35  ;;  %v1111_v35 = vsel %vm54_vm0, %v1897_v55, 0.0  ;;  %v1907_v49 = vpop.eup %1906 }
 0x141   :  { %v1779_v62 = vpop.f32.mrf.mxu0  ;;  %1930 = vtanh.f32 %v659_v57  ;;  %v1909_v20 = vpop.eup %1908  ;;  %v1112_v29 = vadd.f32 %v1111_v35, %v1110_v22  ;;  %v740_v59 = vadd.f32 %v739_v41, %v738_v54  ;;  %v743_v32 = vsel %vm54_vm0, %v1907_v49, 0.0 }
 0x142   :  { %v663_v21 = vpop.f32.mrf.mxu1  ;;  %1932 = vtanh.f32 %v1030_v45  ;;  %v1113_v62 = vsel %vm54_vm0, %v1901_v39, 0.0  ;;  %v1911_v10 = vpop.eup %1910 }
 0x143   :  { %v1034_v60 = vpop.f32.mrf.mxu0  ;;  %v664_v42 = vadd.f32 %v2565_v36, %v663_v21  ;;  %v1913_v21 = vpop.eup %1912  ;;  %v1114_v44 = vadd.f32 %v1113_v62, %v1112_v29  ;;  %v742_v38 = vadd.f32 %v741_v58, %v740_v59  ;;  %v745_v13 = vsel %vm54_vm0, %v1911_v10, 0.0 }
 0x144   :  { %v1702_v46 = vpop.f32.mrf.mxu1  ;;  %v1035_v47 = vadd.f32 %v2565_v36, %v1034_v60  ;;  %v1115_v60 = vsel %vm54_vm0, %v1905_v50, 0.0  ;;  %v1915_v7 = vpop.eup %1914  ;;  %v1119_v51 = vsel %vm54_vm0, %v1913_v21, 0.0 }
 0x145   :  { %v1782_v6 = vpop.f32.mrf.mxu0  ;;  %1934 = vtanh.f32 %v664_v42  ;;  %v1917_v46 = vpop.eup %1916  ;;  %v1116_v17 = vadd.f32 %v1115_v60, %v1114_v44  ;;  %v744_v56 = vadd.f32 %v743_v32, %v742_v38 }
 0x146   :  { %v668_v24 = vpop.f32.mrf.mxu1  ;;  %1936 = vtanh.f32 %v1035_v47  ;;  %v1117_v6 = vsel %vm54_vm0, %v1909_v20, 0.0  ;;  %v1919_v16 = vpop.eup %1918  ;;  %v1121_v45 = vsel %vm54_vm0, %v1917_v46, 0.0 }
 0x147   :  { %v1039_v33 = vpop.f32.mrf.mxu0  ;;  %v669_v53 = vadd.f32 %v2565_v36, %v668_v24  ;;  %v1921_v23 = vpop.eup %1920  ;;  %v747_v24 = vsel %vm54_vm0, %v1915_v7, 0.0  ;;  %v1118_v0 = vadd.f32 %v1117_v6, %v1116_v17  ;;  %v746_v57 = vadd.f32 %v745_v13, %v744_v56 }
 0x148   :  { %v1705_v37 = vpop.f32.mrf.mxu1  ;;  %v1040_v52 = vadd.f32 %v2565_v36, %v1039_v33  ;;  %v1923_v25 = vpop.eup %1922  ;;  %v1123_v18 = vsel %vm54_vm0, %v1921_v23, 0.0 }
 0x149   :  { %v1785_v27 = vpop.f32.mrf.mxu0  ;;  %1938 = vtanh.f32 %v669_v53  ;;  %v1925_v30 = vpop.eup %1924  ;;  %v749_v37 = vsel %vm54_vm0, %v1919_v16, 0.0  ;;  %v1120_v39 = vadd.f32 %v1119_v51, %v1118_v0  ;;  %v748_v15 = vadd.f32 %v747_v24, %v746_v57 }
 0x14a   :  { %v673_v48 = vpop.f32.mrf.mxu1  ;;  %1940 = vtanh.f32 %v1040_v52  ;;  %v1927_v27 = vpop.eup %1926  ;;  %v751_v43 = vsel %vm54_vm0, %v1923_v25, 0.0  ;;  %v1125_v22 = vsel %vm54_vm0, %v1925_v30, 0.0 }
 0x14b   :  { %v1044_v40 = vpop.f32.mrf.mxu0  ;;  %v674_v9 = vadd.f32 %v2565_v36, %v673_v48  ;;  %v1929_v8 = vpop.eup %1928  ;;  %v1122_v50 = vadd.f32 %v1121_v45, %v1120_v39  ;;  %v750_v35 = vadd.f32 %v749_v37, %v748_v15  ;;  %v753_v54 = vsel %vm54_vm0, %v1927_v27, 0.0 }
 0x14c   :  { %v1708_v26 = vpop.f32.mrf.mxu1  ;;  %v1045_v1 = vadd.f32 %v2565_v36, %v1044_v40 }
 0x14d   :  { %v1788_v61 = vpop.f32.mrf.mxu0  ;;  %1942 = vtanh.f32 %v674_v9  ;;  %v1124_v26 = vadd.f32 %v1123_v18, %v1122_v50  ;;  %v1127_v9 = vsel %vm54_vm0, %v1929_v8, 0.0 }
 0x14e   :  { %v678_v2 = vpop.f32.mrf.mxu1  ;;  %1944 = vtanh.f32 %v1045_v1  ;;  %v1931_v40 = vpop.eup %1930  ;;  %v752_v61 = vadd.f32 %v751_v43, %v750_v35 }
 0x14f   :  { %v1049_v19 = vpop.f32.mrf.mxu0  ;;  %v679_v34 = vadd.f32 %v2565_v36, %v678_v2  ;;  %v1933_v49 = vpop.eup %1932  ;;  %v755_v10 = vsel %vm54_vm0, %v1931_v40, 0.0  ;;  %v1126_v2 = vadd.f32 %v1125_v22, %v1124_v26 }
 0x150   :  { %v1050_v5 = vadd.f32 %v2565_v36, %v1049_v19  ;;  %v1711_v11 = vpop.f32.mrf.mxu1  ;;  %v754_v19 = vadd.f32 %v753_v54, %v752_v61 }
 0x151   :  { %v1791_v12 = vpop.f32.mrf.mxu0  ;;  %1946 = vtanh.f32 %v679_v34  ;;  %v1129_v34 = vsel %vm54_vm0, %v1933_v49, 0.0  ;;  %v1128_v38 = vadd.f32 %v1127_v9, %v1126_v2 }
 0x152   :  { %v683_v4 = vpop.f32.mrf.mxu1  ;;  %1948 = vtanh.f32 %v1050_v5  ;;  %v1935_v52 = vpop.eup %1934  ;;  %v756_v5 = vadd.f32 %v755_v10, %v754_v19 }
 0x153   :  { %v1054_v14 = vpop.f32.mrf.mxu0  ;;  %v684_v33 = vadd.f32 %v2565_v36, %v683_v4  ;;  %v1937_v58 = vpop.eup %1936  ;;  %v757_v7 = vsel %vm54_vm0, %v1935_v52, 0.0  ;;  %v1130_v17 = vadd.f32 %v1129_v34, %v1128_v38 }
 0x154   :  { %v1055_v55 = vadd.f32 %v2565_v36, %v1054_v14  ;;  %v1714_v31 = vpop.f32.mrf.mxu1  ;;  %v1131_v46 = vsel %vm54_vm0, %v1937_v58, 0.0  ;;  %v758_v56 = vadd.f32 %v757_v7, %v756_v5 }
 0x155   :  { %v1794_v63 = vpop.f32.mrf.mxu0  ;;  %1950 = vtanh.f32 %v684_v33  ;;  %v1132_v33 = vadd.f32 %v1131_v46, %v1130_v17 }
 0x156   :  { %v688_v42 = vpop.f32.mrf.mxu1  ;;  %1952 = vtanh.f32 %v1055_v55  ;;  %v1939_v1 = vpop.eup %1938 }
 0x157   :  { %v1059_v28 = vpop.f32.mrf.mxu0  ;;  %v689_v47 = vadd.f32 %v2565_v36, %v688_v42  ;;  %v1941_v32 = vpop.eup %1940  ;;  %v759_v6 = vsel %vm54_vm0, %v1939_v1, 0.0 }
 0x158   :  { %v1060_v48 = vadd.f32 %v2565_v36, %v1059_v28  ;;  %v1717_v41 = vpop.f32.mrf.mxu1  ;;  %v1133_v14 = vsel %vm54_vm0, %v1941_v32, 0.0  ;;  %v760_v55 = vadd.f32 %v759_v6, %v758_v56 }
 0x159   :  { %v1797_v53 = vpop.f32.mrf.mxu0  ;;  %1954 = vtanh.f32 %v689_v47  ;;  %v1134_v31 = vadd.f32 %v1133_v14, %v1132_v33  ;;  %v1174_v33 = vlaneseq }
 0x15a   :  { %1956 = vtanh.f32 %v1060_v48  ;;  %v693_v20 = vpop.f32.mrf.mxu1  ;;  %v1943_v44 = vpop.eup %1942 }
 0x15b   :  { %v1064_v62 = vpop.f32.mrf.mxu0  ;;  %v694_v29 = vadd.f32 %v2565_v36, %v693_v20  ;;  %v1945_v12 = vpop.eup %1944  ;;  %v761_v23 = vsel %vm54_vm0, %v1943_v44, 0.0 }
 0x15c   :  { %v1065_v59 = vadd.f32 %v2565_v36, %v1064_v62  ;;  %v1720_v60 = vpop.f32.mrf.mxu1  ;;  %v1135_v25 = vsel %vm54_vm0, %v1945_v12, 0.0 }
 0x15d   :  { %v1800_v21 = vpop.f32.mrf.mxu0  ;;  %1958 = vtanh.f32 %v694_v29  ;;  %v1136_v37 = vadd.f32 %v1135_v25, %v1134_v31 }
 0x15e   :  { %1960 = vtanh.f32 %v1065_v59  ;;  %v1947_v16 = vpop.eup %1946 }
 0x15f   :  { %v1069_v11 = vpop.f32.mrf.mxu0  ;;  %v1949_v4 = vpop.eup %1948  ;;  %v763_v0 = vsel %vm54_vm0, %v1947_v16, 0.0 }
 0x160   :  { %v1070_v13 = vadd.f32 %v2565_v36, %v1069_v11  ;;  %v762_v36 = vadd.f32 %v761_v23, %v760_v55  ;;  %v1137_v63 = vsel %vm54_vm0, %v1949_v4, 0.0  ;;  %v1175_v55 = vshrl.u32 %v1174_v33, 7  ;;  %v1999_v33 = vld [vmem:[%s3380_s0 + $0xd8] sm:$0xff] }
 0x161   :  { %v1803_v51 = vpop.f32.mrf.mxu0  ;;  %v1138_v42 = vadd.f32 %v1137_v63, %v1136_v37  ;;  %v1972_v37 = vld [vmem:[%s3380_s0] sm:$0xff] }
 0x162   :  { %1962 = vtanh.f32 %v1070_v13  ;;  %v1951_v24 = vpop.eup %1950  ;;  %v764_v27 = vadd.f32 %v763_v0, %v762_v36  ;;  %v1176_v25 = vsub.s32 0, %v1175_v55 }
 0x163   :  { %v1953_v57 = vpop.eup %1952  ;;  %v765_v30 = vsel %vm54_vm0, %v1951_v24, 0.0 }
 0x164   :  { %v1139_v15 = vsel %vm54_vm0, %v1953_v57, 0.0  ;;  %v766_v28 = vadd.f32 %v765_v30, %v764_v27 }
 0x165   :  { %v1140_v47 = vadd.f32 %v1139_v15, %v1138_v42 }
 0x166   :  { %v1955_v45 = vpop.eup %1954 }
 0x167   :  { %v1957_v39 = vpop.eup %1956  ;;  %v767_v18 = vsel %vm54_vm0, %v1955_v45, 0.0 }
 0x168   :  { %v1141_v8 = vsel %vm54_vm0, %v1957_v39, 0.0  ;;  %v768_v48 = vadd.f32 %v767_v18, %v766_v28  ;;  %v1973_v39 = vld [vmem:[%s3380_s0 + $0x8] sm:$0xff]  ;;  %v1974_v18 = vld [vmem:[%s3380_s0 + $0x10] sm:$0xff]  ;;  %v1975_v28 = vld [vmem:[%s3380_s0 + $0x18] sm:$0xff] }
 0x169   :  { %v1142_v41 = vadd.f32 %v1141_v8, %v1140_v47 }
 0x16a   :  { %v1959_v43 = vpop.eup %1958 }
 0x16b   :  { %v1961_v40 = vpop.eup %1960  ;;  %v769_v50 = vsel %vm54_vm0, %v1959_v43, 0.0  ;;  %v1976_v43 = vld [vmem:[%s3380_s0 + $0x20] sm:$0xff] }
 0x16c   :  { %v770_v35 = vadd.f32 %v769_v50, %v768_v48  ;;  %v1143_v53 = vsel %vm54_vm0, %v1961_v40, 0.0  ;;  %v1977_v48 = vld [vmem:[%s3380_s0 + $0x28] sm:$0xff]  ;;  %v1978_v50 = vld [vmem:[%s3380_s0 + $0x30] sm:$0xff] }
 0x16d   :  { %v1144_v54 = vadd.f32 %v1143_v53, %v1142_v41  ;;  %v1979_v41 = vld [vmem:[%s3380_s0 + $0x38] sm:$0xff] }
 0x16e   :  { %v771_v22 = vrot.slane %v770_v35, 4 }
 0x16f   :  { %v1963_v49 = vpop.eup %1962 }
 0x170   :  { %v1145_v52 = vsel %vm54_vm0, %v1963_v49, 0.0  ;;  %v772_v26 = vadd.f32 %v771_v22, %v770_v35  ;;  %v1980_v49 = vld [vmem:[%s3380_s0 + $0x40] sm:$0xff] }
 0x171   :  { %v1146_v61 = vadd.f32 %v1145_v52, %v1144_v54  ;;  %v1981_v54 = vld [vmem:[%s3380_s0 + $0x48] sm:$0xff] }
 0x172   :  { %v773_v20 = vrot.slane %v772_v26, 2 }
 0x173   :  { %v1147_v62 = vrot.slane %v1146_v61, 4 }
 0x174   :  { %v774_v58 = vadd.f32 %v773_v20, %v772_v26  ;;  %v1982_v26 = vld [vmem:[%s3380_s0 + $0x50] sm:$0xff]  ;;  %v1983_v20 = vld [vmem:[%s3380_s0 + $0x58] sm:$0xff] }
 0x175   :  { %v1148_v9 = vadd.f32 %v1147_v62, %v1146_v61 }
 0x176   :  { %v775_v10 = vrot.slane %v774_v58, 1 }
 0x177   :  { %v1149_v29 = vrot.slane %v1148_v9, 2 }
 0x178   :  { %v776_v59 = vadd.f32 %v775_v10, %v774_v58  ;;  %v1984_v58 = vld [vmem:[%s3380_s0 + $0x60] sm:$0xff]  ;;  %v1985_v10 = vld [vmem:[%s3380_s0 + $0x68] sm:$0xff] }
 0x179   :  { %v1150_v1 = vadd.f32 %v1149_v29, %v1148_v9 }
 0x17a   :  { %v777_v2 = vmul.f32 0.005, %v776_v59  ;;  %v1986_v59 = vld [vmem:[%s3380_s0 + $0x70] sm:$0xff] }
 0x17b   :  { %v1151_v19 = vrot.slane %v1150_v1, 1 }
 0x17c   :  { %v778_v21 = vmul.f32 %v777_v2, %v2724_v3  ;;  %v1987_v2 = vld [vmem:[%s3380_s0 + $0x78] sm:$0xff] }
 0x17d   :  { %v1152_v60 = vadd.f32 %v1151_v19, %v1150_v1 }
 0x17e   :  { %v779_v32 = vsel %vm402_vm2, %v778_v21, 0.0  ;;  %v1988_v21 = vld [vmem:[%s3380_s0 + $0x80] sm:$0xff] }
 0x17f   :  { %v1153_v34 = vmul.f32 0.005, %v1152_v60  ;;  %780 = vadd.xlane.f32.xlu0 %v779_v32  ;;  %v1989_v32 = vld [vmem:[%s3380_s0 + $0x88] sm:$0xff] }
 0x181   :  { %v1154_v7 = vmul.f32 %v1153_v34, %v2724_v3 }
 0x183   :  { %v1155_v44 = vsel %vm402_vm2, %v1154_v7, 0.0  ;;  %v1990_v7 = vld [vmem:[%s3380_s0 + $0x90] sm:$0xff] }
 0x184   :  { %1156 = vadd.xlane.f32.xlu1 %v1155_v44 }
 0x1c0   :  { %v405_v38 = vpop.xlane.xlu0 %404 }
 0x208   :  { %v781_v5 = vpop.xlane.xlu0 %780 }
 0x209   :  { %v1158_v11 = vmax.f32 %v405_v38, %v781_v5 }
 0x20d   :  { %v1157_v12 = vpop.xlane.xlu1 %1156 }
 0x20e   :  { %v1159_v46 = vmax.f32 %v1158_v11, %v1157_v12  ;;  %v1992_v11 = vld [vmem:[%s3380_s0 + $0xa0] sm:$0xff] }
 0x210   :  { %v1160_v6 = vsub.f32 %v405_v38, %v1159_v46  ;;  %v1163_v13 = vsub.f32 %v781_v5, %v1159_v46  ;;  %v1166_v16 = vsub.f32 %v1157_v12, %v1159_v46  ;;  %v1991_v38 = vld [vmem:[%s3380_s0 + $0x98] sm:$0xff]  ;;  %v1993_v46 = vld [vmem:[%s3380_s0 + $0xa8] sm:$0xff] }
 0x212   :  { %v1161_v17 = vmul.f32 1.442695, %v1160_v6  ;;  %v1164_v56 = vmul.f32 1.442695, %v1163_v13  ;;  %v1167_v51 = vmul.f32 1.442695, %v1166_v16 }
 0x213   :  { %v1994_v13 = vld [vmem:[%s3380_s0 + $0xb0] sm:$0xff] }
 0x214   :  { %1964 = vpow2.f32 %v1161_v17  ;;  %v1995_v17 = vld [vmem:[%s3380_s0 + $0xb8] sm:$0xff] }
 0x215   :  { %1966 = vpow2.f32 %v1164_v56 }
 0x216   :  { %1968 = vpow2.f32 %v1167_v51  ;;  %v1996_v51 = vld [vmem:[%s3380_s0 + $0xc0] sm:$0xff] }
 0x221   :  { %v1965_v4 = vpop.eup %1964 }
 0x222   :  { %v1967_v14 = vpop.eup %1966 }
 0x223   :  { %v1169_v3 = vadd.f32 %v1967_v14, %v1965_v4  ;;  %v1969_v23 = vpop.eup %1968 }
 0x225   :  { %v1170_v24 = vadd.f32 %v1969_v23, %v1169_v3 }
 0x227   :  { %1970 = vrcp.f32 %v1170_v24 }
 0x234   :  { %v1971_v0 = vpop.eup %1970 }
 0x235   :  { %v1173_v57 = vmul.f32 %v1971_v0, %v1965_v4  ;;  %v1203_v31 = vmul.f32 %v1971_v0, %v1967_v14  ;;  %v1258_v36 = vmul.f32 %v1971_v0, %v1969_v23  ;;  %v1997_v14 = vld [vmem:[%s3380_s0 + $0xc8] sm:$0xff]  ;;  %v1998_v23 = vld [vmem:[%s3380_s0 + $0xd0] sm:$0xff] }
 0x237   :  { %v1177_v63 = vrot.slane %v1173_v57, %v1176_v25  ;;  %v2850_v30 = vrot.slane %v1203_v31, %v1176_v25  ;;  %v2852_v45 = vrot.slane %v1258_v36, %v1176_v25  ;;  %v2000_v25 = vld [vmem:[%s3380_s0 + $0xe0] sm:$0xff]  ;;  %v2001_v57 = vld [vmem:[%s3380_s0 + $0xe8] sm:$0xff]  ;;  %v2002_v36 = vld [vmem:[%s3380_s0 + $0xf0] sm:$0xff] }
 0x239   :  { %v2857_v27 = vmul.f32 %v1972_v37, %v1177_v63  ;;  %v2862_v15 = vmul.f32 %v1973_v39, %v1177_v63  ;;  %v2867_v42 = vmul.f32 %v1974_v18, %v1177_v63  ;;  %v2872_v8 = vmul.f32 %v1975_v28, %v1177_v63  ;;  %v2003_v37 = vld [vmem:[%s3380_s0 + $0xf8] sm:$0xff]  ;;  %v2004_v18 = vld [vmem:[%s3380_s0 + $0x100] sm:$0xff] }
 0x23a   :  { %v2877_v47 = vmul.f32 %v1976_v43, %v1177_v63  ;;  %v2882_v40 = vmul.f32 %v1977_v48, %v1177_v63  ;;  %v2887_v35 = vmul.f32 %v1978_v50, %v1177_v63  ;;  %v2892_v53 = vmul.f32 %v1979_v41, %v1177_v63  ;;  %v2005_v43 = vld [vmem:[%s3380_s0 + $0x108] sm:$0xff]  ;;  %v2006_v50 = vld [vmem:[%s3380_s0 + $0x110] sm:$0xff] }
 0x23b   :  { %v2897_v22 = vmul.f32 %v1980_v49, %v1177_v63  ;;  %v2902_v52 = vmul.f32 %v1981_v54, %v1177_v63  ;;  %v2907_v61 = vmul.f32 %v1982_v26, %v1177_v63  ;;  %v2912_v62 = vmul.f32 %v1983_v20, %v1177_v63  ;;  %v2007_v49 = vld [vmem:[%s3380_s0 + $0x118] sm:$0xff]  ;;  %v2008_v26 = vld [vmem:[%s3380_s0 + $0x120] sm:$0xff] }
 0x23c   :  { %v2917_v9 = vmul.f32 %v1984_v58, %v1177_v63  ;;  %v2922_v29 = vmul.f32 %v1985_v10, %v1177_v63  ;;  %v2927_v1 = vmul.f32 %v1986_v59, %v1177_v63  ;;  %v2932_v19 = vmul.f32 %v1987_v2, %v1177_v63  ;;  %v2009_v58 = vld [vmem:[%s3380_s0 + $0x128] sm:$0xff]  ;;  %v2010_v59 = vld [vmem:[%s3380_s0 + $0x130] sm:$0xff] }
 0x23d   :  { %v2937_v60 = vmul.f32 %v1988_v21, %v1177_v63  ;;  %v2942_v34 = vmul.f32 %v1989_v32, %v1177_v63  ;;  %v2947_v44 = vmul.f32 %v1990_v7, %v1177_v63  ;;  %v2952_v5 = vmul.f32 %v1991_v38, %v1177_v63  ;;  %v2011_v21 = vld [vmem:[%s3380_s0 + $0x138] sm:$0xff]  ;;  %v2012_v7 = vld [vmem:[%s3380_s0 + $0x140] sm:$0xff] }
 0x23e   :  { %v2957_v12 = vmul.f32 %v1992_v11, %v1177_v63  ;;  %v2962_v6 = vmul.f32 %v1993_v46, %v1177_v63  ;;  %v2967_v16 = vmul.f32 %v1994_v13, %v1177_v63  ;;  %v2972_v56 = vmul.f32 %v1995_v17, %v1177_v63  ;;  %v2013_v11 = vld [vmem:[%s3380_s0 + $0x148] sm:$0xff]  ;;  %v2014_v13 = vld [vmem:[%s3380_s0 + $0x150] sm:$0xff] }
 0x23f   :  { %v2977_v4 = vmul.f32 %v1996_v51, %v1177_v63  ;;  %v1208_v3 = vmul.f32 %v1997_v14, %v2850_v30  ;;  %v1209_v24 = vmul.f32 %v1998_v23, %v2850_v30  ;;  %v1210_v55 = vmul.f32 %v1999_v33, %v2850_v30  ;;  %v2015_v51 = vld [vmem:[%s3380_s0 + $0x158] sm:$0xff]  ;;  %v2016_v23 = vld [vmem:[%s3380_s0 + $0x160] sm:$0xff] }
 0x240   :  { %v1211_v0 = vmul.f32 %v2000_v25, %v2850_v30  ;;  %v1212_v31 = vmul.f32 %v2001_v57, %v2850_v30  ;;  %v1213_v63 = vmul.f32 %v2002_v36, %v2850_v30  ;;  %v1214_v39 = vmul.f32 %v2003_v37, %v2850_v30  ;;  %v2017_v25 = vld [vmem:[%s3380_s0 + $0x168] sm:$0xff]  ;;  %v2018_v36 = vld [vmem:[%s3380_s0 + $0x170] sm:$0xff] }
 0x241   :  { %v1215_v28 = vmul.f32 %v2004_v18, %v2850_v30  ;;  %v1216_v48 = vmul.f32 %v2005_v43, %v2850_v30  ;;  %v1217_v41 = vmul.f32 %v2006_v50, %v2850_v30  ;;  %v1218_v54 = vmul.f32 %v2007_v49, %v2850_v30  ;;  %v2019_v18 = vld [vmem:[%s3380_s0 + $0x178] sm:$0xff]  ;;  %v2020_v50 = vld [vmem:[%s3380_s0 + $0x180] sm:$0xff] }
 0x242   :  { %v1219_v20 = vmul.f32 %v2008_v26, %v2850_v30  ;;  %v1220_v10 = vmul.f32 %v2009_v58, %v2850_v30  ;;  %v1221_v2 = vmul.f32 %v2010_v59, %v2850_v30  ;;  %v1222_v32 = vmul.f32 %v2011_v21, %v2850_v30  ;;  %v2021_v26 = vld [vmem:[%s3380_s0 + $0x188] sm:$0xff] }
 0x243   :  { %v1223_v38 = vmul.f32 %v2012_v7, %v2850_v30  ;;  %v1224_v46 = vmul.f32 %v2013_v11, %v2850_v30  ;;  %v1225_v17 = vmul.f32 %v2014_v13, %v2850_v30  ;;  %v1226_v14 = vmul.f32 %v2015_v51, %v2850_v30 }
 0x244   :  { %v1227_v33 = vmul.f32 %v2016_v23, %v2850_v30  ;;  %v1228_v57 = vmul.f32 %v2017_v25, %v2850_v30  ;;  %v1229_v37 = vmul.f32 %v2018_v36, %v2850_v30  ;;  %v1230_v43 = vmul.f32 %v2019_v18, %v2850_v30  ;;  %v2035_v23 = vld [vmem:[%s3380_s0 + $0x1f8] sm:$0xff]  ;;  %v2036_v25 = vld [vmem:[%s3380_s0 + $0x200] sm:$0xff]  ;;  %v2037_v36 = vld [vmem:[%s3380_s0 + $0x208] sm:$0xff] }
 0x245   :  { %v1231_v49 = vmul.f32 %v2020_v50, %v2850_v30  ;;  %v1232_v58 = vmul.f32 %v2021_v26, %v2850_v30  ;;  %v3080_v59 = vadd.f32 %v1208_v3, %v2857_v27  ;;  %v3083_v21 = vadd.f32 %v1209_v24, %v2862_v15  ;;  %v2026_v24 = vld [vmem:[%s3380_s0 + $0x1b0] sm:$0xff]  ;;  %v2039_v50 = vld [vmem:[%s3380_s0 + $0x218] sm:$0xff]  ;;  %v2040_v26 = vld [vmem:[%s3380_s0 + $0x220] sm:$0xff] }
 0x246   :  { %v3086_v7 = vadd.f32 %v1210_v55, %v2867_v42  ;;  %v3089_v11 = vadd.f32 %v1211_v0, %v2872_v8  ;;  %v3092_v13 = vadd.f32 %v1212_v31, %v2877_v47  ;;  %v3095_v51 = vadd.f32 %v1213_v63, %v2882_v40  ;;  %v2027_v0 = vld [vmem:[%s3380_s0 + $0x1b8] sm:$0xff]  ;;  %v2028_v63 = vld [vmem:[%s3380_s0 + $0x1c0] sm:$0xff]  ;;  %v2038_v18 = vld [vmem:[%s3380_s0 + $0x210] sm:$0xff] }
 0x247   :  { %v3098_v30 = vadd.f32 %v1214_v39, %v2887_v35  ;;  %v3101_v27 = vadd.f32 %v1215_v28, %v2892_v53  ;;  %v3104_v15 = vadd.f32 %v1216_v48, %v2897_v22  ;;  %v3107_v42 = vadd.f32 %v1217_v41, %v2902_v52  ;;  %v2029_v28 = vld [vmem:[%s3380_s0 + $0x1c8] sm:$0xff]  ;;  %v2030_v41 = vld [vmem:[%s3380_s0 + $0x1d0] sm:$0xff] }
 0x248   :  { %v3110_v8 = vadd.f32 %v1218_v54, %v2907_v61  ;;  %v3113_v47 = vadd.f32 %v1219_v20, %v2912_v62  ;;  %v3116_v40 = vadd.f32 %v1220_v10, %v2917_v9  ;;  %v3119_v35 = vadd.f32 %v1221_v2, %v2922_v29  ;;  %v2031_v20 = vld [vmem:[%s3380_s0 + $0x1d8] sm:$0xff]  ;;  %v2032_v2 = vld [vmem:[%s3380_s0 + $0x1e0] sm:$0xff] }
 0x249   :  { %v3122_v53 = vadd.f32 %v1222_v32, %v2927_v1  ;;  %v3125_v22 = vadd.f32 %v1223_v38, %v2932_v19  ;;  %v3128_v52 = vadd.f32 %v1224_v46, %v2937_v60  ;;  %v3131_v61 = vadd.f32 %v1225_v17, %v2942_v34  ;;  %v2033_v38 = vld [vmem:[%s3380_s0 + $0x1e8] sm:$0xff]  ;;  %v2034_v17 = vld [vmem:[%s3380_s0 + $0x1f0] sm:$0xff] }
 0x24a   :  { %v3134_v62 = vadd.f32 %v1226_v14, %v2947_v44  ;;  %v3137_v9 = vadd.f32 %v1227_v33, %v2952_v5  ;;  %v3140_v29 = vadd.f32 %v1228_v57, %v2957_v12  ;;  %v3143_v1 = vadd.f32 %v1229_v37, %v2962_v6  ;;  %v2022_v44 = vld [vmem:[%s3380_s0 + $0x190] sm:$0xff]  ;;  %v2023_v12 = vld [vmem:[%s3380_s0 + $0x198] sm:$0xff] }
 0x24b   :  { %v3146_v19 = vadd.f32 %v1230_v43, %v2967_v16  ;;  %v3149_v60 = vadd.f32 %v1231_v49, %v2972_v56  ;;  %v3152_v34 = vadd.f32 %v1232_v58, %v2977_v4  ;;  %v1263_v5 = vmul.f32 %v2022_v44, %v2852_v45  ;;  %v2024_v16 = vld [vmem:[%s3380_s0 + $0x1a0] sm:$0xff]  ;;  %v2025_v4 = vld [vmem:[%s3380_s0 + $0x1a8] sm:$0xff] }
 0x24c   :  { %v1264_v6 = vmul.f32 %v2023_v12, %v2852_v45  ;;  %v1265_v56 = vmul.f32 %v2024_v16, %v2852_v45  ;;  %v1266_v3 = vmul.f32 %v2025_v4, %v2852_v45  ;;  %v1267_v55 = vmul.f32 %v2026_v24, %v2852_v45  ;;  %v2041_v44 = vld [vmem:[%s3380_s0 + $0x228] sm:$0xff]  ;;  %v2042_v16 = vld [vmem:[%s3380_s0 + $0x230] sm:$0xff]  ;;  %v2043_v24 = vld [vmem:[%s3380_s0 + $0x238] sm:$0xff] }
 0x24d   :  { %v1268_v31 = vmul.f32 %v2027_v0, %v2852_v45  ;;  %v1269_v39 = vmul.f32 %v2028_v63, %v2852_v45  ;;  %v1270_v48 = vmul.f32 %v2029_v28, %v2852_v45  ;;  %v1271_v54 = vmul.f32 %v2030_v41, %v2852_v45  ;;  %v2044_v63 = vld [vmem:[%s3380_s0 + $0x240] sm:$0xff]  ;;  %v2045_v41 = vld [vmem:[%s3380_s0 + $0x248] sm:$0xff] }
 0x24e   :  { %v1272_v10 = vmul.f32 %v2031_v20, %v2852_v45  ;;  %v1273_v32 = vmul.f32 %v2032_v2, %v2852_v45  ;;  %v1274_v46 = vmul.f32 %v2033_v38, %v2852_v45  ;;  %v1275_v14 = vmul.f32 %v2034_v17, %v2852_v45  ;;  %v2046_v2 = vld [vmem:[%s3380_s0 + $0x250] sm:$0xff] }
 0x24f   :  { %v1276_v33 = vmul.f32 %v2035_v23, %v2852_v45  ;;  %v1277_v57 = vmul.f32 %v2036_v25, %v2852_v45  ;;  %v1278_v37 = vmul.f32 %v2037_v36, %v2852_v45  ;;  %v1279_v43 = vmul.f32 %v2038_v18, %v2852_v45 }
 0x250   :  { %v1280_v49 = vmul.f32 %v2039_v50, %v2852_v45  ;;  %v1281_v58 = vmul.f32 %v2040_v26, %v2852_v45  ;;  %v1282_v12 = vmul.f32 %v2041_v44, %v2852_v45  ;;  %v1283_v4 = vmul.f32 %v2042_v16, %v2852_v45 }
 0x251   :  { %v1284_v0 = vmul.f32 %v2043_v24, %v2852_v45  ;;  %v1285_v28 = vmul.f32 %v2044_v63, %v2852_v45  ;;  %v1286_v20 = vmul.f32 %v2045_v41, %v2852_v45  ;;  %v1287_v38 = vmul.f32 %v2046_v2, %v2852_v45 }
 0x252   :  { %v1288_v17 = vadd.f32 %v1263_v5, %v3080_v59  ;;  %v1289_v23 = vadd.f32 %v1264_v6, %v3083_v21  ;;  %v1290_v25 = vadd.f32 %v1265_v56, %v3086_v7  ;;  %v1291_v36 = vadd.f32 %v1266_v3, %v3089_v11 }
 0x253   :  { %v1292_v18 = vadd.f32 %v1267_v55, %v3092_v13  ;;  %v1293_v50 = vadd.f32 %v1268_v31, %v3095_v51  ;;  %v1294_v26 = vadd.f32 %v1269_v39, %v3098_v30  ;;  %v1295_v44 = vadd.f32 %v1270_v48, %v3101_v27 }
 0x254   :  { %v1296_v16 = vadd.f32 %v1271_v54, %v3104_v15  ;;  %v1297_v45 = vadd.f32 %v1272_v10, %v3107_v42  ;;  %v1298_v59 = vadd.f32 %v1273_v32, %v3110_v8  ;;  %v1299_v21 = vadd.f32 %v1274_v46, %v3113_v47  ;;  %1313 = vst.msk [vmem:[%s3383_s4] sm:$0xff] %vm54_vm0, %v1288_v17 }
 0x255   :  { %1314 = vst.msk [vmem:[%s3383_s4 + $0x8] sm:$0xff] %vm54_vm0, %v1289_v23  ;;  %1315 = vst.msk [vmem:[%s3383_s4 + $0x10] sm:$0xff] %vm54_vm0, %v1290_v25  ;;  %v1300_v7 = vadd.f32 %v1275_v14, %v3116_v40  ;;  %v1301_v11 = vadd.f32 %v1276_v33, %v3119_v35  ;;  %v1302_v13 = vadd.f32 %v1277_v57, %v3122_v53 }
 0x256   :  { %1316 = vst.msk [vmem:[%s3383_s4 + $0x18] sm:$0xff] %vm54_vm0, %v1291_v36  ;;  %v1303_v51 = vadd.f32 %v1278_v37, %v3125_v22  ;;  %1317 = vst.msk [vmem:[%s3383_s4 + $0x20] sm:$0xff] %vm54_vm0, %v1292_v18  ;;  %v1304_v30 = vadd.f32 %v1279_v43, %v3128_v52  ;;  %v1305_v27 = vadd.f32 %v1280_v49, %v3131_v61 }
 0x257   :  { %1318 = vst.msk [vmem:[%s3383_s4 + $0x28] sm:$0xff] %vm54_vm0, %v1293_v50  ;;  %1319 = vst.msk [vmem:[%s3383_s4 + $0x30] sm:$0xff] %vm54_vm0, %v1294_v26  ;;  %v1306_v15 = vadd.f32 %v1281_v58, %v3134_v62  ;;  %v1307_v42 = vadd.f32 %v1282_v12, %v3137_v9  ;;  %v1308_v8 = vadd.f32 %v1283_v4, %v3140_v29 }
 0x258   :  { %1320 = vst.msk [vmem:[%s3383_s4 + $0x38] sm:$0xff] %vm54_vm0, %v1295_v44  ;;  %1321 = vst.msk [vmem:[%s3383_s4 + $0x40] sm:$0xff] %vm54_vm0, %v1296_v16  ;;  %v1309_v47 = vadd.f32 %v1284_v0, %v3143_v1  ;;  %v1310_v40 = vadd.f32 %v1285_v28, %v3146_v19  ;;  %v1311_v35 = vadd.f32 %v1286_v20, %v3149_v60 }
 0x259   :  { %1322 = vst.msk [vmem:[%s3383_s4 + $0x48] sm:$0xff] %vm54_vm0, %v1297_v45  ;;  %1323 = vst.msk [vmem:[%s3383_s4 + $0x50] sm:$0xff] %vm54_vm0, %v1298_v59  ;;  %v1312_v53 = vadd.f32 %v1287_v38, %v3152_v34 }
 0x25a   :  { %1324 = vst.msk [vmem:[%s3383_s4 + $0x58] sm:$0xff] %vm54_vm0, %v1299_v21  ;;  %1325 = vst.msk [vmem:[%s3383_s4 + $0x60] sm:$0xff] %vm54_vm0, %v1300_v7 }
 0x25b   :  { %1326 = vst.msk [vmem:[%s3383_s4 + $0x68] sm:$0xff] %vm54_vm0, %v1301_v11  ;;  %1327 = vst.msk [vmem:[%s3383_s4 + $0x70] sm:$0xff] %vm54_vm0, %v1302_v13 }
 0x25c   :  { %1328 = vst.msk [vmem:[%s3383_s4 + $0x78] sm:$0xff] %vm54_vm0, %v1303_v51  ;;  %1329 = vst.msk [vmem:[%s3383_s4 + $0x80] sm:$0xff] %vm54_vm0, %v1304_v30 }
 0x25d   :  { %1330 = vst.msk [vmem:[%s3383_s4 + $0x88] sm:$0xff] %vm54_vm0, %v1305_v27  ;;  %1331 = vst.msk [vmem:[%s3383_s4 + $0x90] sm:$0xff] %vm54_vm0, %v1306_v15 }
 0x25e   :  { %1332 = vst.msk [vmem:[%s3383_s4 + $0x98] sm:$0xff] %vm54_vm0, %v1307_v42  ;;  %1333 = vst.msk [vmem:[%s3383_s4 + $0xa0] sm:$0xff] %vm54_vm0, %v1308_v8 }
 0x25f   :  { %1334 = vst.msk [vmem:[%s3383_s4 + $0xa8] sm:$0xff] %vm54_vm0, %v1309_v47  ;;  %1335 = vst.msk [vmem:[%s3383_s4 + $0xb0] sm:$0xff] %vm54_vm0, %v1310_v40 }
 0x260   :  { %1336 = vst.msk [vmem:[%s3383_s4 + $0xb8] sm:$0xff] %vm54_vm0, %v1311_v35  ;;  %1337 = vst.msk [vmem:[%s3383_s4 + $0xc0] sm:$0xff] %vm54_vm0, %v1312_v53 }

</bundles_post_ra>
